<compile_context>
chip_gen: v6e
topology: v6e:2x2x1
jax: 0.10.0
libtpu: 0.0.40
codegen_flags: <defaults>
</compile_context>

<pallas_src>
import functools
import math

import jax
import jax.numpy as jnp
from jax import lax
from jax.experimental import pallas as pl
from jax.experimental.pallas import tpu as pltpu


# --------------------------------------------------------------------------
# Helpers
# --------------------------------------------------------------------------
def _layernorm(x, w, b, eps):
    # x: (R, E) f32 ; w, b: (1, E) f32
    mean = jnp.mean(x, axis=-1, keepdims=True)
    var = jnp.mean(jnp.square(x - mean), axis=-1, keepdims=True)
    return (x - mean) * lax.rsqrt(var + eps) * w + b


def _pick_tile(dim, pref, mult):
    """Largest divisor of `dim` that is <= pref and a multiple of `mult`.
    Falls back to the full dim (always a legal block size)."""
    if dim <= pref:
        return dim
    t = (pref // mult) * mult
    while t >= mult:
        if dim % t == 0:
            return t
        t -= mult
    return dim


# --------------------------------------------------------------------------
# Kernel A: LayerNorm1 + fused QKV projection (Conv1D: x @ W + b)
# --------------------------------------------------------------------------
def ln_qkv_kernel(x_ref, ln1w_ref, ln1b_ref, wqkv_ref, bqkv_ref,
                  q_ref, k_ref, v_ref, *, eps, embed):
    h = _layernorm(x_ref[0], ln1w_ref[...], ln1b_ref[...], eps)
    qkv = jnp.dot(h.astype(jnp.bfloat16), wqkv_ref[...],
                  preferred_element_type=jnp.float32) + bqkv_ref[...]
    qkv = qkv.astype(jnp.bfloat16)
    # E-wide (lane aligned when E % 128 == 0) slices of the fused projection.
    q_ref[0] = qkv[:, 0 * embed:1 * embed]
    k_ref[0] = qkv[:, 1 * embed:2 * embed]
    v_ref[0] = qkv[:, 2 * embed:3 * embed]


def run_ln_qkv(x, ln1w, ln1b, wqkv, bqkv, *, eps, tile_r):
    B, S, E = x.shape
    tr = tile_r
    out_sd = jax.ShapeDtypeStruct((B, S, E), jnp.bfloat16)
    return pl.pallas_call(
        functools.partial(ln_qkv_kernel, eps=eps, embed=E),
        out_shape=(out_sd, out_sd, out_sd),
        grid_spec=pltpu.PrefetchScalarGridSpec(
            num_scalar_prefetch=0,
            grid=(B, S // tr),
            in_specs=[
                pl.BlockSpec((1, tr, E), lambda b, r: (b, r, 0)),
                pl.BlockSpec((1, E), lambda b, r: (0, 0)),
                pl.BlockSpec((1, E), lambda b, r: (0, 0)),
                pl.BlockSpec((E, 3 * E), lambda b, r: (0, 0)),
                pl.BlockSpec((1, 3 * E), lambda b, r: (0, 0)),
            ],
            out_specs=(
                pl.BlockSpec((1, tr, E), lambda b, r: (b, r, 0)),
                pl.BlockSpec((1, tr, E), lambda b, r: (b, r, 0)),
                pl.BlockSpec((1, tr, E), lambda b, r: (b, r, 0)),
            ),
        ),
        compiler_params=pltpu.CompilerParams(
            dimension_semantics=("parallel", "parallel")),
    )(x, ln1w, ln1b, wqkv, bqkv)


# --------------------------------------------------------------------------
# Kernel B: flash-style multi-head attention (online softmax over KV tiles)
# --------------------------------------------------------------------------
def flash_attn_kernel(q_ref, k_ref, v_ref, amask_ref, o_ref,
                      m_sc, l_sc, acc_sc, *, scale):
    ki = pl.program_id(2)

    @pl.when(ki == 0)
    def _():
        m_sc[...] = jnp.full_like(m_sc, -jnp.inf)
        l_sc[...] = jnp.zeros_like(l_sc)
        acc_sc[...] = jnp.zeros_like(acc_sc)

    q = q_ref[0]                 # (H, TQ, D) bf16
    k = k_ref[0]                 # (H, TK, D) bf16
    v = v_ref[0]                 # (H, TK, D) bf16
    H, TQ, D = q.shape
    TK = k.shape[1]

    # batched over heads: (H, TQ, TK) f32 scores
    s = lax.dot_general(q, k, (((2,), (2,)), ((0,), (0,))),
                        preferred_element_type=jnp.float32) * scale

    # causal mask for this (q-tile, kv-tile) + additive attention mask
    row = pl.program_id(1) * TQ + lax.broadcasted_iota(jnp.int32, (TQ, TK), 0)
    col = ki * TK + lax.broadcasted_iota(jnp.int32, (TQ, TK), 1)
    causal = (col <= row)[None, :, :]
    s = jnp.where(causal, s, jnp.float32(-10000.0)) + amask_ref[...]

    m_prev = m_sc[...]
    m_new = jnp.maximum(m_prev, jnp.max(s, axis=-1, keepdims=True))
    alpha = jnp.exp(m_prev - m_new)
    p = jnp.exp(s - m_new)
    l_sc[...] = alpha * l_sc[...] + jnp.sum(p, axis=-1, keepdims=True)
    acc_sc[...] = alpha * acc_sc[...] + lax.dot_general(
        p.astype(jnp.bfloat16), v, (((2,), (1,)), ((0,), (0,))),
        preferred_element_type=jnp.float32)
    m_sc[...] = m_new

    @pl.when(ki == pl.num_programs(2) - 1)
    def _():
        o_ref[0] = (acc_sc[...] / l_sc[...]).astype(o_ref.dtype)


def run_flash_attention(q4, k4, v4, amask3, *, tile_q, tile_k):
    B, H, S, D = q4.shape
    scale = 1.0 / math.sqrt(D)
    return pl.pallas_call(
        functools.partial(flash_attn_kernel, scale=scale),
        out_shape=jax.ShapeDtypeStruct((B, H, S, D), jnp.bfloat16),
        grid_spec=pltpu.PrefetchScalarGridSpec(
            num_scalar_prefetch=0,
            grid=(B, S // tile_q, S // tile_k),
            in_specs=[
                pl.BlockSpec((1, H, tile_q, D), lambda b, qi, ki: (b, 0, qi, 0)),
                pl.BlockSpec((1, H, tile_k, D), lambda b, qi, ki: (b, 0, ki, 0)),
                pl.BlockSpec((1, H, tile_k, D), lambda b, qi, ki: (b, 0, ki, 0)),
                pl.BlockSpec((1, 1, tile_k), lambda b, qi, ki: (b, 0, ki)),
            ],
            out_specs=pl.BlockSpec((1, H, tile_q, D),
                                   lambda b, qi, ki: (b, 0, qi, 0)),
            scratch_shapes=[
                pltpu.VMEM((H, tile_q, 1), jnp.float32),   # running max
                pltpu.VMEM((H, tile_q, 1), jnp.float32),   # running denom
                pltpu.VMEM((H, tile_q, D), jnp.float32),   # running output
            ],
        ),
        compiler_params=pltpu.CompilerParams(
            dimension_semantics=("parallel", "parallel", "arbitrary")),
    )(q4, k4, v4, amask3)


# --------------------------------------------------------------------------
# Kernel C: output projection + residual + LN2 + MLP (tiled over I) + residual
#           (+ optional fused final LayerNorm)
# --------------------------------------------------------------------------
def proj_mlp_kernel(x_ref, ctx_ref, wo_ref, bo_ref, ln2w_ref, ln2b_ref,
                    wfc_ref, bfc_ref, wp2_ref, bp2_ref, lnfw_ref, lnfb_ref,
                    o_ref, x1_sc, h2_sc, acc_sc, *, eps, final_ln):
    it = pl.program_id(2)

    @pl.when(it == 0)
    def _():
        # single full-E output projection (heads already merged)
        attn = jnp.dot(ctx_ref[0], wo_ref[...],
                       preferred_element_type=jnp.float32) + bo_ref[...]
        x1 = x_ref[0] + attn
        x1_sc[...] = x1
        h2_sc[...] = _layernorm(x1, ln2w_ref[...], ln2b_ref[...],
                                eps).astype(jnp.bfloat16)
        acc_sc[...] = jnp.zeros_like(acc_sc)

    # MLP, tiled over the intermediate dimension I
    ff = jnp.dot(h2_sc[...], wfc_ref[...],
                 preferred_element_type=jnp.float32) + bfc_ref[...]
    ff = jnp.maximum(ff, 0.0)                       # ReLU (config asserts relu)
    acc_sc[...] += jnp.dot(ff.astype(jnp.bfloat16), wp2_ref[...],
                           preferred_element_type=jnp.float32)

    @pl.when(it == pl.num_programs(2) - 1)
    def _():
        out = x1_sc[...] + acc_sc[...] + bp2_ref[...]
        if final_ln:
            out = _layernorm(out, lnfw_ref[...], lnfb_ref[...], eps)
        o_ref[0] = out


def run_proj_mlp(x, ctx, p, lnfw, lnfb, *, eps, final_ln, tile_r, tile_i):
    B, S, E = x.shape
    I = p["wfc"].shape[1]
    tr, ti = tile_r, tile_i
    # TODO(synk): once pipeline_mode=pl.Buffered(1) is validated on this jax
    # version, single-buffer the grid-invariant weight specs for v7x VMEM.
    return pl.pallas_call(
        functools.partial(proj_mlp_kernel, eps=eps, final_ln=final_ln),
        out_shape=jax.ShapeDtypeStruct((B, S, E), jnp.float32),
        grid_spec=pltpu.PrefetchScalarGridSpec(
            num_scalar_prefetch=0,
            grid=(B, S // tr, I // ti),
            in_specs=[
                pl.BlockSpec((1, tr, E), lambda b, r, i: (b, r, 0)),   # residual
                pl.BlockSpec((1, tr, E), lambda b, r, i: (b, r, 0)),   # attn ctx
                pl.BlockSpec((E, E), lambda b, r, i: (0, 0)),          # Wo
                pl.BlockSpec((1, E), lambda b, r, i: (0, 0)),          # bo
                pl.BlockSpec((1, E), lambda b, r, i: (0, 0)),          # ln2 w
                pl.BlockSpec((1, E), lambda b, r, i: (0, 0)),          # ln2 b
                pl.BlockSpec((E, ti), lambda b, r, i: (0, i)),         # Wfc tile
                pl.BlockSpec((1, ti), lambda b, r, i: (0, i)),         # bfc tile
                pl.BlockSpec((ti, E), lambda b, r, i: (i, 0)),         # Wp2 tile
                pl.BlockSpec((1, E), lambda b, r, i: (0, 0)),          # bp2
                pl.BlockSpec((1, E), lambda b, r, i: (0, 0)),          # lnf w
                pl.BlockSpec((1, E), lambda b, r, i: (0, 0)),          # lnf b
            ],
            out_specs=pl.BlockSpec((1, tr, E), lambda b, r, i: (b, r, 0)),
            scratch_shapes=[
                pltpu.VMEM((tr, E), jnp.float32),     # x1 (post-attn residual)
                pltpu.VMEM((tr, E), jnp.bfloat16),    # ln2 output
                pltpu.VMEM((tr, E), jnp.float32),     # MLP accumulator
            ],
        ),
        compiler_params=pltpu.CompilerParams(
            dimension_semantics=("parallel", "parallel", "arbitrary")),
    )(x, ctx, p["wo"], p["bo"], p["ln2w"], p["ln2b"],
      p["wfc"], p["bfc"], p["wp2"], p["bp2"], lnfw, lnfb)


# --------------------------------------------------------------------------
# One GPT2Block
# --------------------------------------------------------------------------
def run_gpt2_block(x, amask3, p, lnfw, lnfb, *, num_heads, eps, final_ln):
    B, S, E = x.shape
    D = E // num_heads
    I = p["wfc"].shape[1]
    tr = _pick_tile(S, 256, 8)
    tq = _pick_tile(S, 256, 8)
    tk = _pick_tile(S, 256, 8)
    ti = _pick_tile(I, 512, 128)

    q, k, v = run_ln_qkv(x, p["ln1w"], p["ln1b"], p["wqkv"], p["bqkv"],
                         eps=eps, tile_r=tr)

    # head split / merge is pure layout plumbing — left to XLA outside kernels
    def to_heads(t):
        return t.reshape(B, S, num_heads, D).transpose(0, 2, 1, 3)

    ctx4 = run_flash_attention(to_heads(q), to_heads(k), to_heads(v), amask3,
                               tile_q=tq, tile_k=tk)
    ctx = ctx4.transpose(0, 2, 1, 3).reshape(B, S, E)

    return run_proj_mlp(x, ctx, p, lnfw, lnfb, eps=eps, final_ln=final_ln,
                        tile_r=tr, tile_i=ti)


# --------------------------------------------------------------------------
# Parameter init (deterministic, synthetic — mirrors module __init__ shapes)
# --------------------------------------------------------------------------
def init_params(key, *, vocab_size, n_positions, n_embd, n_inner, n_layer):
    std = 0.02
    keys = iter(jax.random.split(key, 2 + n_layer * 4))

    def w(shape):  # matmul weights streamed in bf16
        return (jax.random.normal(next(keys), shape, jnp.float32) * std
                ).astype(jnp.bfloat16)

    params = {
        "wte": jax.random.normal(next(keys), (vocab_size, n_embd), jnp.float32) * std,
        "wpe": jax.random.normal(next(keys), (n_positions, n_embd), jnp.float32) * std,
        "lnf_w": jnp.ones((1, n_embd), jnp.float32),
        "lnf_b": jnp.zeros((1, n_embd), jnp.float32),
        "blocks": [],
    }
    for _ in range(n_layer):
        blk = {
            "ln1w": jnp.ones((1, n_embd), jnp.float32),
            "ln1b": jnp.zeros((1, n_embd), jnp.float32),
            "wqkv": w((n_embd, 3 * n_embd)),          # fused q/k/v Conv1D weight
            "bqkv": jnp.zeros((1, 3 * n_embd), jnp.float32),
            "wo": w((n_embd, n_embd)),
            "bo": jnp.zeros((1, n_embd), jnp.float32),
            "ln2w": jnp.ones((1, n_embd), jnp.float32),
            "ln2b": jnp.zeros((1, n_embd), jnp.float32),
            "wfc": w((n_embd, n_inner)),
            "bfc": jnp.zeros((1, n_inner), jnp.float32),
            "wp2": w((n_inner, n_embd)),
            "bp2": jnp.zeros((1, n_embd), jnp.float32),
        }
        params["blocks"].append(blk)
    return params


# --------------------------------------------------------------------------
# GPT2Model.forward
# --------------------------------------------------------------------------
def gpt2_forward(params, input_ids, attention_mask=None, position_ids=None,
                 *, num_heads, eps=1e-5):
    B, S = input_ids.shape
    if position_ids is None:
        position_ids = jnp.arange(S, dtype=jnp.int32)[None, :]
    position_ids = jnp.broadcast_to(position_ids, (B, S))

    # embedding gathers (glue in plain JAX)
    inputs_embeds = jnp.take(params["wte"], input_ids, axis=0)
    position_embeds = jnp.take(params["wpe"], position_ids, axis=0)
    hidden = (inputs_embeds + position_embeds).astype(jnp.float32)
    # self.drop(...) -> identity in inference

    if attention_mask is not None:
        amask = (1.0 - attention_mask.astype(jnp.float32).reshape(B, S)) * -10000.0
    else:
        amask = jnp.zeros((B, S), jnp.float32)
    amask3 = amask.reshape(B, 1, S)

    n_layer = len(params["blocks"])
    for li, blk in enumerate(params["blocks"]):
        hidden = run_gpt2_block(hidden, amask3, blk,
                                params["lnf_w"], params["lnf_b"],
                                num_heads=num_heads, eps=eps,
                                final_ln=(li == n_layer - 1))
    # final LayerNorm is fused into the last block's kernel
    return hidden


# --------------------------------------------------------------------------
# Main
# --------------------------------------------------------------------------
if __name__ == "__main__":
    # Small GPT-2-like config
    vocab_size = 128
    n_positions = 16
    n_embd = 32
    n_head = 4
    n_layer = 2
    n_inner = 4 * n_embd
    batch, seq = 2, 8

    key = jax.random.PRNGKey(0)
    pkey, ikey = jax.random.split(key)
    params = init_params(pkey, vocab_size=vocab_size, n_positions=n_positions,
                         n_embd=n_embd, n_inner=n_inner, n_layer=n_layer)

    input_ids = jax.random.randint(ikey, (batch, seq), 0, vocab_size,
                                   dtype=jnp.int32)
    attention_mask = jnp.ones((batch, seq), jnp.float32)

    fwd = jax.jit(functools.partial(gpt2_forward, num_heads=n_head, eps=1e-5))
    out = fwd(params, input_ids, attention_mask)
    out = jax.block_until_ready(out)
    assert out.shape == (batch, seq, n_embd), out.shape
    assert bool(jnp.all(jnp.isfinite(out))), "non-finite output"
    print("KERNEL_OK")
</pallas_src>

<mosaic_0001>
module attributes {stable_mosaic.version = 11 : i64} {
  func.func @flash_attn_kernel(%arg0: i32, %arg1: i32, %arg2: i32, %arg3: memref<1x4x8x8xbf16, #tpu.memory_space<vmem>>, %arg4: memref<1x4x8x8xbf16, #tpu.memory_space<vmem>>, %arg5: memref<1x4x8x8xbf16, #tpu.memory_space<vmem>>, %arg6: memref<1x1x8xf32, #tpu.memory_space<vmem>>, %arg7: memref<1x4x8x8xbf16, #tpu.memory_space<vmem>>, %arg8: memref<4x8x1xf32, #tpu.memory_space<vmem>>, %arg9: memref<4x8x1xf32, #tpu.memory_space<vmem>>, %arg10: memref<4x8x8xf32, #tpu.memory_space<vmem>>) attributes {dimension_semantics = [#tpu.dimension_semantics<parallel>, #tpu.dimension_semantics<parallel>, #tpu.dimension_semantics<arbitrary>], iteration_bounds = array<i64: 2, 1, 1>, scalar_prefetch = 0 : i64, scratch_operands = 3 : i64, tpu.core_type = #tpu.core_type<tc>, window_params = [{transform_indices = @transform_0, window_bounds = array<i64: 1, 4, 8, 8>}, {transform_indices = @transform_1, window_bounds = array<i64: 1, 4, 8, 8>}, {transform_indices = @transform_2, window_bounds = array<i64: 1, 4, 8, 8>}, {transform_indices = @transform_3, window_bounds = array<i64: 1, 1, 8>}, {transform_indices = @transform_4, window_bounds = array<i64: 1, 4, 8, 8>}]} {
    %c0_i32 = arith.constant 0 : i32
    %0 = arith.cmpi eq, %arg2, %c0_i32 : i32
    %1 = arith.extui %0 : i1 to i32
    %c0_i32_0 = arith.constant 0 : i32
    %2 = arith.cmpi ne, %1, %c0_i32_0 : i32
    scf.if %2 {
      %cst_41 = arith.constant 0xFF800000 : f32
      %55 = vector.broadcast %cst_41 : f32 to vector<4x8x1xf32>
      %c0_42 = arith.constant 0 : index
      %c0_43 = arith.constant 0 : index
      %c0_44 = arith.constant 0 : index
      %56 = vector.load %arg8[%c0_42, %c0_43, %c0_44] : memref<4x8x1xf32, #tpu.memory_space<vmem>>, vector<4x8x1xf32>
      tpu.vector_store %arg8[%c0_42, %c0_43, %c0_44], %55 {strides = array<i32>} : memref<4x8x1xf32, #tpu.memory_space<vmem>>, vector<4x8x1xf32>,
      %cst_45 = arith.constant 0.000000e+00 : f32
      %57 = vector.broadcast %cst_45 : f32 to vector<4x8x1xf32>
      %c0_46 = arith.constant 0 : index
      %c0_47 = arith.constant 0 : index
      %c0_48 = arith.constant 0 : index
      %58 = vector.load %arg9[%c0_46, %c0_47, %c0_48] : memref<4x8x1xf32, #tpu.memory_space<vmem>>, vector<4x8x1xf32>
      tpu.vector_store %arg9[%c0_46, %c0_47, %c0_48], %57 {strides = array<i32>} : memref<4x8x1xf32, #tpu.memory_space<vmem>>, vector<4x8x1xf32>,
      %cst_49 = arith.constant 0.000000e+00 : f32
      %59 = vector.broadcast %cst_49 : f32 to vector<4x8x8xf32>
      %c0_50 = arith.constant 0 : index
      %c0_51 = arith.constant 0 : index
      %c0_52 = arith.constant 0 : index
      %60 = vector.load %arg10[%c0_50, %c0_51, %c0_52] : memref<4x8x8xf32, #tpu.memory_space<vmem>>, vector<4x8x8xf32>
      tpu.vector_store %arg10[%c0_50, %c0_51, %c0_52], %59 {strides = array<i32>} : memref<4x8x8xf32, #tpu.memory_space<vmem>>, vector<4x8x8xf32>,
    } else {
    }
    %c0 = arith.constant 0 : index
    %c0_1 = arith.constant 0 : index
    %c0_2 = arith.constant 0 : index
    %c0_3 = arith.constant 0 : index
    %3 = vector.load %arg3[%c0, %c0_1, %c0_2, %c0_3] : memref<1x4x8x8xbf16, #tpu.memory_space<vmem>>, vector<1x4x8x8xbf16>
    %4 = vector.shape_cast %3 : vector<1x4x8x8xbf16> to vector<4x8x8xbf16>
    %c0_4 = arith.constant 0 : index
    %c0_5 = arith.constant 0 : index
    %c0_6 = arith.constant 0 : index
    %c0_7 = arith.constant 0 : index
    %5 = vector.load %arg4[%c0_4, %c0_5, %c0_6, %c0_7] : memref<1x4x8x8xbf16, #tpu.memory_space<vmem>>, vector<1x4x8x8xbf16>
    %6 = vector.shape_cast %5 : vector<1x4x8x8xbf16> to vector<4x8x8xbf16>
    %c0_8 = arith.constant 0 : index
    %c0_9 = arith.constant 0 : index
    %c0_10 = arith.constant 0 : index
    %c0_11 = arith.constant 0 : index
    %7 = vector.load %arg5[%c0_8, %c0_9, %c0_10, %c0_11] : memref<1x4x8x8xbf16, #tpu.memory_space<vmem>>, vector<1x4x8x8xbf16>
    %8 = vector.shape_cast %7 : vector<1x4x8x8xbf16> to vector<4x8x8xbf16>
    %cst = arith.constant dense<0.000000e+00> : vector<4x8x8xf32>
    %9 = tpu.matmul %4, %6, %cst {dimension_numbers = #tpu.dot_dimension_numbers<[2], [2], [1], [1], [0, 0, 0, 1, 1, 1], [0], [0]>} : vector<4x8x8xbf16>, vector<4x8x8xbf16>, vector<4x8x8xf32> -> vector<4x8x8xf32>
    %cst_12 = arith.constant 0.353553385 : f32
    %10 = vector.broadcast %cst_12 : f32 to vector<4x8x8xf32>
    %11 = arith.mulf %9, %10 : vector<4x8x8xf32>
    %c8_i32 = arith.constant 8 : i32
    %12 = arith.muli %arg1, %c8_i32 : i32
    %13 = tpu.iota {dimensions = array<i32: 0>} : vector<8x8xi32>
    %14 = vector.broadcast %12 : i32 to vector<8x8xi32>
    %15 = arith.addi %14, %13 : vector<8x8xi32>
    %c8_i32_13 = arith.constant 8 : i32
    %16 = arith.muli %arg2, %c8_i32_13 : i32
    %17 = tpu.iota {dimensions = array<i32: 1>} : vector<8x8xi32>
    %18 = vector.broadcast %16 : i32 to vector<8x8xi32>
    %19 = arith.addi %18, %17 : vector<8x8xi32>
    %20 = arith.cmpi sle, %19, %15 : vector<8x8xi32>
    %21 = vector.shape_cast %20 : vector<8x8xi1> to vector<1x8x8xi1>
    %cst_14 = arith.constant -1.000000e+04 : f32
    %22 = vector.shape_cast %21 : vector<1x8x8xi1> to vector<1x8x8xi1>
    %23 = vector.broadcast %22 : vector<1x8x8xi1> to vector<4x8x8xi1>
    %24 = vector.broadcast %cst_14 : f32 to vector<4x8x8xf32>
    %25 = arith.select %23, %11, %24 : vector<4x8x8xi1>, vector<4x8x8xf32>
    %c0_15 = arith.constant 0 : index
    %c0_16 = arith.constant 0 : index
    %c0_17 = arith.constant 0 : index
    %26 = vector.load %arg6[%c0_15, %c0_16, %c0_17] : memref<1x1x8xf32, #tpu.memory_space<vmem>>, vector<1x1x8xf32>
    %27 = vector.broadcast %26 : vector<1x1x8xf32> to vector<4x8x8xf32>
    %28 = arith.addf %25, %27 : vector<4x8x8xf32>
    %c0_18 = arith.constant 0 : index
    %c0_19 = arith.constant 0 : index
    %c0_20 = arith.constant 0 : index
    %29 = vector.load %arg8[%c0_18, %c0_19, %c0_20] : memref<4x8x1xf32, #tpu.memory_space<vmem>>, vector<4x8x1xf32>
    %cst_21 = arith.constant dense<0xFF800000> : vector<4x8xf32>
    %30 = vector.multi_reduction <maximumf>, %28, %cst_21 [2] : vector<4x8x8xf32> to vector<4x8xf32>
    %31 = vector.shape_cast %30 : vector<4x8xf32> to vector<4x8x1xf32>
    %32 = arith.maximumf %29, %31 : vector<4x8x1xf32>
    %33 = arith.subf %29, %32 : vector<4x8x1xf32>
    %34 = math.exp %33 : vector<4x8x1xf32>
    %35 = vector.broadcast %32 : vector<4x8x1xf32> to vector<4x8x8xf32>
    %36 = arith.subf %28, %35 : vector<4x8x8xf32>
    %37 = math.exp %36 : vector<4x8x8xf32>
    %c0_22 = arith.constant 0 : index
    %c0_23 = arith.constant 0 : index
    %c0_24 = arith.constant 0 : index
    %38 = vector.load %arg9[%c0_22, %c0_23, %c0_24] : memref<4x8x1xf32, #tpu.memory_space<vmem>>, vector<4x8x1xf32>
    %39 = arith.mulf %34, %38 : vector<4x8x1xf32>
    %cst_25 = arith.constant dense<0.000000e+00> : vector<4x8xf32>
    %40 = vector.multi_reduction <add>, %37, %cst_25 [2] : vector<4x8x8xf32> to vector<4x8xf32>
    %41 = vector.shape_cast %40 : vector<4x8xf32> to vector<4x8x1xf32>
    %42 = arith.addf %39, %41 : vector<4x8x1xf32>
    %c0_26 = arith.constant 0 : index
    %c0_27 = arith.constant 0 : index
    %c0_28 = arith.constant 0 : index
    %43 = vector.load %arg9[%c0_26, %c0_27, %c0_28] : memref<4x8x1xf32, #tpu.memory_space<vmem>>, vector<4x8x1xf32>
    tpu.vector_store %arg9[%c0_26, %c0_27, %c0_28], %42 {strides = array<i32>} : memref<4x8x1xf32, #tpu.memory_space<vmem>>, vector<4x8x1xf32>,
    %c0_29 = arith.constant 0 : index
    %c0_30 = arith.constant 0 : index
    %c0_31 = arith.constant 0 : index
    %44 = vector.load %arg10[%c0_29, %c0_30, %c0_31] : memref<4x8x8xf32, #tpu.memory_space<vmem>>, vector<4x8x8xf32>
    %45 = vector.broadcast %34 : vector<4x8x1xf32> to vector<4x8x8xf32>
    %46 = arith.mulf %45, %44 : vector<4x8x8xf32>
    %47 = arith.truncf %37 : vector<4x8x8xf32> to vector<4x8x8xbf16>
    %cst_32 = arith.constant dense<0.000000e+00> : vector<4x8x8xf32>
    %48 = tpu.matmul %47, %8, %cst_32 {dimension_numbers = #tpu.dot_dimension_numbers<[2], [1], [1], [2], [0, 0, 0, 1, 1, 2], [0], [0]>} : vector<4x8x8xbf16>, vector<4x8x8xbf16>, vector<4x8x8xf32> -> vector<4x8x8xf32>
    %49 = arith.addf %46, %48 : vector<4x8x8xf32>
    %c0_33 = arith.constant 0 : index
    %c0_34 = arith.constant 0 : index
    %c0_35 = arith.constant 0 : index
    %50 = vector.load %arg10[%c0_33, %c0_34, %c0_35] : memref<4x8x8xf32, #tpu.memory_space<vmem>>, vector<4x8x8xf32>
    tpu.vector_store %arg10[%c0_33, %c0_34, %c0_35], %49 {strides = array<i32>} : memref<4x8x8xf32, #tpu.memory_space<vmem>>, vector<4x8x8xf32>,
    %c0_36 = arith.constant 0 : index
    %c0_37 = arith.constant 0 : index
    %c0_38 = arith.constant 0 : index
    %51 = vector.load %arg8[%c0_36, %c0_37, %c0_38] : memref<4x8x1xf32, #tpu.memory_space<vmem>>, vector<4x8x1xf32>
    tpu.vector_store %arg8[%c0_36, %c0_37, %c0_38], %32 {strides = array<i32>} : memref<4x8x1xf32, #tpu.memory_space<vmem>>, vector<4x8x1xf32>,
    %c0_i32_39 = arith.constant 0 : i32
    %52 = arith.cmpi eq, %arg2, %c0_i32_39 : i32
    %53 = arith.extui %52 : i1 to i32
    %c0_i32_40 = arith.constant 0 : i32
    %54 = arith.cmpi ne, %53, %c0_i32_40 : i32
    scf.if %54 {
      %c0_41 = arith.constant 0 : index
      %c0_42 = arith.constant 0 : index
      %c0_43 = arith.constant 0 : index
      %55 = vector.load %arg10[%c0_41, %c0_42, %c0_43] : memref<4x8x8xf32, #tpu.memory_space<vmem>>, vector<4x8x8xf32>
      %c0_44 = arith.constant 0 : index
      %c0_45 = arith.constant 0 : index
      %c0_46 = arith.constant 0 : index
      %56 = vector.load %arg9[%c0_44, %c0_45, %c0_46] : memref<4x8x1xf32, #tpu.memory_space<vmem>>, vector<4x8x1xf32>
      %57 = vector.broadcast %56 : vector<4x8x1xf32> to vector<4x8x8xf32>
      %58 = arith.divf %55, %57 : vector<4x8x8xf32>
      %59 = arith.truncf %58 : vector<4x8x8xf32> to vector<4x8x8xbf16>
      %c0_47 = arith.constant 0 : index
      %c0_48 = arith.constant 0 : index
      %c0_49 = arith.constant 0 : index
      %c0_50 = arith.constant 0 : index
      %60 = vector.load %arg7[%c0_47, %c0_48, %c0_49, %c0_50] : memref<1x4x8x8xbf16, #tpu.memory_space<vmem>>, vector<1x4x8x8xbf16>
      %61 = vector.shape_cast %60 : vector<1x4x8x8xbf16> to vector<4x8x8xbf16>
      %62 = vector.shape_cast %59 : vector<4x8x8xbf16> to vector<1x4x8x8xbf16>
      tpu.vector_store %arg7[%c0_47, %c0_48, %c0_49, %c0_50], %62 {strides = array<i32>} : memref<1x4x8x8xbf16, #tpu.memory_space<vmem>>, vector<1x4x8x8xbf16>,
    } else {
    }
    return
  }
  func.func @transform_0(%arg0: i32, %arg1: i32, %arg2: i32) -> (i32, i32, i32, i32) {
    %c0_i32 = arith.constant 0 : i32
    %c0_i32_0 = arith.constant 0 : i32
    %c0_i32_1 = arith.constant 0 : i32
    return %arg0, %c0_i32, %arg1, %c0_i32_0 : i32, i32, i32, i32
  }
  func.func @transform_1(%arg0: i32, %arg1: i32, %arg2: i32) -> (i32, i32, i32, i32) {
    %c0_i32 = arith.constant 0 : i32
    %c0_i32_0 = arith.constant 0 : i32
    %c0_i32_1 = arith.constant 0 : i32
    return %arg0, %c0_i32, %arg2, %c0_i32_0 : i32, i32, i32, i32
  }
  func.func @transform_2(%arg0: i32, %arg1: i32, %arg2: i32) -> (i32, i32, i32, i32) {
    %c0_i32 = arith.constant 0 : i32
    %c0_i32_0 = arith.constant 0 : i32
    %c0_i32_1 = arith.constant 0 : i32
    return %arg0, %c0_i32, %arg2, %c0_i32_0 : i32, i32, i32, i32
  }
  func.func @transform_3(%arg0: i32, %arg1: i32, %arg2: i32) -> (i32, i32, i32) {
    %c0_i32 = arith.constant 0 : i32
    %c0_i32_0 = arith.constant 0 : i32
    return %arg0, %c0_i32, %arg2 : i32, i32, i32
  }
  func.func @transform_4(%arg0: i32, %arg1: i32, %arg2: i32) -> (i32, i32, i32, i32) {
    %c0_i32 = arith.constant 0 : i32
    %c0_i32_0 = arith.constant 0 : i32
    %c0_i32_1 = arith.constant 0 : i32
    return %arg0, %c0_i32, %arg1, %c0_i32_0 : i32, i32, i32, i32
  }
}

module attributes {stable_mosaic.version = 11 : i64} {
  func.func @ln_qkv_kernel(%arg0: i32, %arg1: i32, %arg2: memref<1x8x32xf32, #tpu.memory_space<vmem>>, %arg3: memref<1x32xf32, #tpu.memory_space<vmem>>, %arg4: memref<1x32xf32, #tpu.memory_space<vmem>>, %arg5: memref<32x96xbf16, #tpu.memory_space<vmem>>, %arg6: memref<1x96xf32, #tpu.memory_space<vmem>>, %arg7: memref<1x8x32xbf16, #tpu.memory_space<vmem>>, %arg8: memref<1x8x32xbf16, #tpu.memory_space<vmem>>, %arg9: memref<1x8x32xbf16, #tpu.memory_space<vmem>>) attributes {dimension_semantics = [#tpu.dimension_semantics<parallel>, #tpu.dimension_semantics<parallel>], iteration_bounds = array<i64: 2, 1>, scalar_prefetch = 0 : i64, scratch_operands = 0 : i64, tpu.core_type = #tpu.core_type<tc>, window_params = [{transform_indices = @transform_0, window_bounds = array<i64: 1, 8, 32>}, {pipeline_mode = #tpu.pipeline_mode<synchronous>, transform_indices = @transform_1, window_bounds = array<i64: 1, 32>}, {pipeline_mode = #tpu.pipeline_mode<synchronous>, transform_indices = @transform_2, window_bounds = array<i64: 1, 32>}, {pipeline_mode = #tpu.pipeline_mode<synchronous>, transform_indices = @transform_3, window_bounds = array<i64: 32, 96>}, {pipeline_mode = #tpu.pipeline_mode<synchronous>, transform_indices = @transform_4, window_bounds = array<i64: 1, 96>}, {transform_indices = @transform_5, window_bounds = array<i64: 1, 8, 32>}, {transform_indices = @transform_6, window_bounds = array<i64: 1, 8, 32>}, {transform_indices = @transform_7, window_bounds = array<i64: 1, 8, 32>}]} {
    %c0 = arith.constant 0 : index
    %c0_0 = arith.constant 0 : index
    %c0_1 = arith.constant 0 : index
    %0 = vector.load %arg2[%c0, %c0_0, %c0_1] : memref<1x8x32xf32, #tpu.memory_space<vmem>>, vector<1x8x32xf32>
    %1 = vector.shape_cast %0 : vector<1x8x32xf32> to vector<8x32xf32>
    %c0_2 = arith.constant 0 : index
    %c0_3 = arith.constant 0 : index
    %2 = vector.load %arg3[%c0_2, %c0_3] : memref<1x32xf32, #tpu.memory_space<vmem>>, vector<1x32xf32>
    %c0_4 = arith.constant 0 : index
    %c0_5 = arith.constant 0 : index
    %3 = vector.load %arg4[%c0_4, %c0_5] : memref<1x32xf32, #tpu.memory_space<vmem>>, vector<1x32xf32>
    %cst = arith.constant dense<0.000000e+00> : vector<8xf32>
    %4 = vector.multi_reduction <add>, %1, %cst [1] : vector<8x32xf32> to vector<8xf32>
    %5 = vector.shape_cast %4 : vector<8xf32> to vector<8x1xf32>
    %cst_6 = arith.constant 3.200000e+01 : f32
    %6 = vector.broadcast %cst_6 : f32 to vector<8x1xf32>
    %7 = arith.divf %5, %6 : vector<8x1xf32>
    %8 = vector.broadcast %7 : vector<8x1xf32> to vector<8x32xf32>
    %9 = arith.subf %1, %8 : vector<8x32xf32>
    %10 = arith.mulf %9, %9 : vector<8x32xf32>
    %cst_7 = arith.constant dense<0.000000e+00> : vector<8xf32>
    %11 = vector.multi_reduction <add>, %10, %cst_7 [1] : vector<8x32xf32> to vector<8xf32>
    %12 = vector.shape_cast %11 : vector<8xf32> to vector<8x1xf32>
    %cst_8 = arith.constant 3.200000e+01 : f32
    %13 = vector.broadcast %cst_8 : f32 to vector<8x1xf32>
    %14 = arith.divf %12, %13 : vector<8x1xf32>
    %15 = vector.broadcast %7 : vector<8x1xf32> to vector<8x32xf32>
    %16 = arith.subf %1, %15 : vector<8x32xf32>
    %cst_9 = arith.constant 9.99999974E-6 : f32
    %17 = vector.broadcast %cst_9 : f32 to vector<8x1xf32>
    %18 = arith.addf %14, %17 : vector<8x1xf32>
    %19 = math.rsqrt %18 : vector<8x1xf32>
    %20 = vector.broadcast %19 : vector<8x1xf32> to vector<8x32xf32>
    %21 = arith.mulf %16, %20 : vector<8x32xf32>
    %22 = vector.broadcast %2 : vector<1x32xf32> to vector<8x32xf32>
    %23 = arith.mulf %21, %22 : vector<8x32xf32>
    %24 = vector.broadcast %3 : vector<1x32xf32> to vector<8x32xf32>
    %25 = arith.addf %23, %24 : vector<8x32xf32>
    %26 = arith.truncf %25 : vector<8x32xf32> to vector<8x32xbf16>
    %c0_10 = arith.constant 0 : index
    %c0_11 = arith.constant 0 : index
    %27 = vector.load %arg5[%c0_10, %c0_11] : memref<32x96xbf16, #tpu.memory_space<vmem>>, vector<32x96xbf16>
    %cst_12 = arith.constant dense<0.000000e+00> : vector<8x96xf32>
    %28 = tpu.matmul %26, %27, %cst_12 {dimension_numbers = #tpu.dot_dimension_numbers<[1], [0], [0], [1], [0, 0, 1, 1], [], []>} : vector<8x32xbf16>, vector<32x96xbf16>, vector<8x96xf32> -> vector<8x96xf32>
    %c0_13 = arith.constant 0 : index
    %c0_14 = arith.constant 0 : index
    %29 = vector.load %arg6[%c0_13, %c0_14] : memref<1x96xf32, #tpu.memory_space<vmem>>, vector<1x96xf32>
    %30 = vector.broadcast %29 : vector<1x96xf32> to vector<8x96xf32>
    %31 = arith.addf %28, %30 : vector<8x96xf32>
    %32 = arith.truncf %31 : vector<8x96xf32> to vector<8x96xbf16>
    %33 = vector.extract_strided_slice %32 {offsets = [0, 0], sizes = [8, 32], strides = [1, 1]} : vector<8x96xbf16> to vector<8x32xbf16>
    %c0_15 = arith.constant 0 : index
    %c0_16 = arith.constant 0 : index
    %c0_17 = arith.constant 0 : index
    %34 = vector.load %arg7[%c0_15, %c0_16, %c0_17] : memref<1x8x32xbf16, #tpu.memory_space<vmem>>, vector<1x8x32xbf16>
    %35 = vector.shape_cast %34 : vector<1x8x32xbf16> to vector<8x32xbf16>
    %36 = vector.shape_cast %33 : vector<8x32xbf16> to vector<1x8x32xbf16>
    tpu.vector_store %arg7[%c0_15, %c0_16, %c0_17], %36 {strides = array<i32>} : memref<1x8x32xbf16, #tpu.memory_space<vmem>>, vector<1x8x32xbf16>,
    %37 = vector.extract_strided_slice %32 {offsets = [0, 32], sizes = [8, 32], strides = [1, 1]} : vector<8x96xbf16> to vector<8x32xbf16>
    %c0_18 = arith.constant 0 : index
    %c0_19 = arith.constant 0 : index
    %c0_20 = arith.constant 0 : index
    %38 = vector.load %arg8[%c0_18, %c0_19, %c0_20] : memref<1x8x32xbf16, #tpu.memory_space<vmem>>, vector<1x8x32xbf16>
    %39 = vector.shape_cast %38 : vector<1x8x32xbf16> to vector<8x32xbf16>
    %40 = vector.shape_cast %37 : vector<8x32xbf16> to vector<1x8x32xbf16>
    tpu.vector_store %arg8[%c0_18, %c0_19, %c0_20], %40 {strides = array<i32>} : memref<1x8x32xbf16, #tpu.memory_space<vmem>>, vector<1x8x32xbf16>,
    %41 = vector.extract_strided_slice %32 {offsets = [0, 64], sizes = [8, 32], strides = [1, 1]} : vector<8x96xbf16> to vector<8x32xbf16>
    %c0_21 = arith.constant 0 : index
    %c0_22 = arith.constant 0 : index
    %c0_23 = arith.constant 0 : index
    %42 = vector.load %arg9[%c0_21, %c0_22, %c0_23] : memref<1x8x32xbf16, #tpu.memory_space<vmem>>, vector<1x8x32xbf16>
    %43 = vector.shape_cast %42 : vector<1x8x32xbf16> to vector<8x32xbf16>
    %44 = vector.shape_cast %41 : vector<8x32xbf16> to vector<1x8x32xbf16>
    tpu.vector_store %arg9[%c0_21, %c0_22, %c0_23], %44 {strides = array<i32>} : memref<1x8x32xbf16, #tpu.memory_space<vmem>>, vector<1x8x32xbf16>,
    return
  }
  func.func @transform_0(%arg0: i32, %arg1: i32) -> (i32, i32, i32) {
    %c0_i32 = arith.constant 0 : i32
    %c0_i32_0 = arith.constant 0 : i32
    return %arg0, %arg1, %c0_i32 : i32, i32, i32
  }
  func.func @transform_1(%arg0: i32, %arg1: i32) -> (i32, i32) {
    %c0_i32 = arith.constant 0 : i32
    %c0_i32_0 = arith.constant 0 : i32
    %c0_i32_1 = arith.constant 0 : i32
    return %c0_i32, %c0_i32_0 : i32, i32
  }
  func.func @transform_2(%arg0: i32, %arg1: i32) -> (i32, i32) {
    %c0_i32 = arith.constant 0 : i32
    %c0_i32_0 = arith.constant 0 : i32
    %c0_i32_1 = arith.constant 0 : i32
    return %c0_i32, %c0_i32_0 : i32, i32
  }
  func.func @transform_3(%arg0: i32, %arg1: i32) -> (i32, i32) {
    %c0_i32 = arith.constant 0 : i32
    %c0_i32_0 = arith.constant 0 : i32
    %c0_i32_1 = arith.constant 0 : i32
    return %c0_i32, %c0_i32_0 : i32, i32
  }
  func.func @transform_4(%arg0: i32, %arg1: i32) -> (i32, i32) {
    %c0_i32 = arith.constant 0 : i32
    %c0_i32_0 = arith.constant 0 : i32
    %c0_i32_1 = arith.constant 0 : i32
    return %c0_i32, %c0_i32_0 : i32, i32
  }
  func.func @transform_5(%arg0: i32, %arg1: i32) -> (i32, i32, i32) {
    %c0_i32 = arith.constant 0 : i32
    %c0_i32_0 = arith.constant 0 : i32
    return %arg0, %arg1, %c0_i32 : i32, i32, i32
  }
  func.func @transform_6(%arg0: i32, %arg1: i32) -> (i32, i32, i32) {
    %c0_i32 = arith.constant 0 : i32
    %c0_i32_0 = arith.constant 0 : i32
    return %arg0, %arg1, %c0_i32 : i32, i32, i32
  }
  func.func @transform_7(%arg0: i32, %arg1: i32) -> (i32, i32, i32) {
    %c0_i32 = arith.constant 0 : i32
    %c0_i32_0 = arith.constant 0 : i32
    return %arg0, %arg1, %c0_i32 : i32, i32, i32
  }
}

module attributes {stable_mosaic.version = 11 : i64} {
  func.func @proj_mlp_kernel(%arg0: i32, %arg1: i32, %arg2: i32, %arg3: memref<1x8x32xf32, #tpu.memory_space<vmem>>, %arg4: memref<1x8x32xbf16, #tpu.memory_space<vmem>>, %arg5: memref<32x32xbf16, #tpu.memory_space<vmem>>, %arg6: memref<1x32xf32, #tpu.memory_space<vmem>>, %arg7: memref<1x32xf32, #tpu.memory_space<vmem>>, %arg8: memref<1x32xf32, #tpu.memory_space<vmem>>, %arg9: memref<32x128xbf16, #tpu.memory_space<vmem>>, %arg10: memref<1x128xf32, #tpu.memory_space<vmem>>, %arg11: memref<128x32xbf16, #tpu.memory_space<vmem>>, %arg12: memref<1x32xf32, #tpu.memory_space<vmem>>, %arg13: memref<1x32xf32, #tpu.memory_space<vmem>>, %arg14: memref<1x32xf32, #tpu.memory_space<vmem>>, %arg15: memref<1x8x32xf32, #tpu.memory_space<vmem>>, %arg16: memref<8x32xf32, #tpu.memory_space<vmem>>, %arg17: memref<8x32xbf16, #tpu.memory_space<vmem>>, %arg18: memref<8x32xf32, #tpu.memory_space<vmem>>) attributes {dimension_semantics = [#tpu.dimension_semantics<parallel>, #tpu.dimension_semantics<parallel>, #tpu.dimension_semantics<arbitrary>], iteration_bounds = array<i64: 2, 1, 1>, scalar_prefetch = 0 : i64, scratch_operands = 3 : i64, tpu.core_type = #tpu.core_type<tc>, window_params = [{transform_indices = @transform_0, window_bounds = array<i64: 1, 8, 32>}, {transform_indices = @transform_1, window_bounds = array<i64: 1, 8, 32>}, {pipeline_mode = #tpu.pipeline_mode<synchronous>, transform_indices = @transform_2, window_bounds = array<i64: 32, 32>}, {pipeline_mode = #tpu.pipeline_mode<synchronous>, transform_indices = @transform_3, window_bounds = array<i64: 1, 32>}, {pipeline_mode = #tpu.pipeline_mode<synchronous>, transform_indices = @transform_4, window_bounds = array<i64: 1, 32>}, {pipeline_mode = #tpu.pipeline_mode<synchronous>, transform_indices = @transform_5, window_bounds = array<i64: 1, 32>}, {transform_indices = @transform_6, window_bounds = array<i64: 32, 128>}, {transform_indices = @transform_7, window_bounds = array<i64: 1, 128>}, {transform_indices = @transform_8, window_bounds = array<i64: 128, 32>}, {pipeline_mode = #tpu.pipeline_mode<synchronous>, transform_indices = @transform_9, window_bounds = array<i64: 1, 32>}, {pipeline_mode = #tpu.pipeline_mode<synchronous>, transform_indices = @transform_10, window_bounds = array<i64: 1, 32>}, {pipeline_mode = #tpu.pipeline_mode<synchronous>, transform_indices = @transform_11, window_bounds = array<i64: 1, 32>}, {transform_indices = @transform_12, window_bounds = array<i64: 1, 8, 32>}]} {
    %c0_i32 = arith.constant 0 : i32
    %0 = arith.cmpi eq, %arg2, %c0_i32 : i32
    %1 = arith.extui %0 : i1 to i32
    %c0_i32_0 = arith.constant 0 : i32
    %2 = arith.cmpi ne, %1, %c0_i32_0 : i32
    scf.if %2 {
      %c0_16 = arith.constant 0 : index
      %c0_17 = arith.constant 0 : index
      %c0_18 = arith.constant 0 : index
      %20 = vector.load %arg4[%c0_16, %c0_17, %c0_18] : memref<1x8x32xbf16, #tpu.memory_space<vmem>>, vector<1x8x32xbf16>
      %21 = vector.shape_cast %20 : vector<1x8x32xbf16> to vector<8x32xbf16>
      %c0_19 = arith.constant 0 : index
      %c0_20 = arith.constant 0 : index
      %22 = vector.load %arg5[%c0_19, %c0_20] : memref<32x32xbf16, #tpu.memory_space<vmem>>, vector<32x32xbf16>
      %cst_21 = arith.constant dense<0.000000e+00> : vector<8x32xf32>
      %23 = tpu.matmul %21, %22, %cst_21 {dimension_numbers = #tpu.dot_dimension_numbers<[1], [0], [0], [1], [0, 0, 1, 1], [], []>} : vector<8x32xbf16>, vector<32x32xbf16>, vector<8x32xf32> -> vector<8x32xf32>
      %c0_22 = arith.constant 0 : index
      %c0_23 = arith.constant 0 : index
      %24 = vector.load %arg6[%c0_22, %c0_23] : memref<1x32xf32, #tpu.memory_space<vmem>>, vector<1x32xf32>
      %25 = vector.broadcast %24 : vector<1x32xf32> to vector<8x32xf32>
      %26 = arith.addf %23, %25 : vector<8x32xf32>
      %c0_24 = arith.constant 0 : index
      %c0_25 = arith.constant 0 : index
      %c0_26 = arith.constant 0 : index
      %27 = vector.load %arg3[%c0_24, %c0_25, %c0_26] : memref<1x8x32xf32, #tpu.memory_space<vmem>>, vector<1x8x32xf32>
      %28 = vector.shape_cast %27 : vector<1x8x32xf32> to vector<8x32xf32>
      %29 = arith.addf %28, %26 : vector<8x32xf32>
      %c0_27 = arith.constant 0 : index
      %c0_28 = arith.constant 0 : index
      %30 = vector.load %arg16[%c0_27, %c0_28] : memref<8x32xf32, #tpu.memory_space<vmem>>, vector<8x32xf32>
      tpu.vector_store %arg16[%c0_27, %c0_28], %29 {strides = array<i32>} : memref<8x32xf32, #tpu.memory_space<vmem>>, vector<8x32xf32>,
      %c0_29 = arith.constant 0 : index
      %c0_30 = arith.constant 0 : index
      %31 = vector.load %arg7[%c0_29, %c0_30] : memref<1x32xf32, #tpu.memory_space<vmem>>, vector<1x32xf32>
      %c0_31 = arith.constant 0 : index
      %c0_32 = arith.constant 0 : index
      %32 = vector.load %arg8[%c0_31, %c0_32] : memref<1x32xf32, #tpu.memory_space<vmem>>, vector<1x32xf32>
      %cst_33 = arith.constant dense<0.000000e+00> : vector<8xf32>
      %33 = vector.multi_reduction <add>, %29, %cst_33 [1] : vector<8x32xf32> to vector<8xf32>
      %34 = vector.shape_cast %33 : vector<8xf32> to vector<8x1xf32>
      %cst_34 = arith.constant 3.200000e+01 : f32
      %35 = vector.broadcast %cst_34 : f32 to vector<8x1xf32>
      %36 = arith.divf %34, %35 : vector<8x1xf32>
      %37 = vector.broadcast %36 : vector<8x1xf32> to vector<8x32xf32>
      %38 = arith.subf %29, %37 : vector<8x32xf32>
      %39 = arith.mulf %38, %38 : vector<8x32xf32>
      %cst_35 = arith.constant dense<0.000000e+00> : vector<8xf32>
      %40 = vector.multi_reduction <add>, %39, %cst_35 [1] : vector<8x32xf32> to vector<8xf32>
      %41 = vector.shape_cast %40 : vector<8xf32> to vector<8x1xf32>
      %cst_36 = arith.constant 3.200000e+01 : f32
      %42 = vector.broadcast %cst_36 : f32 to vector<8x1xf32>
      %43 = arith.divf %41, %42 : vector<8x1xf32>
      %44 = vector.broadcast %36 : vector<8x1xf32> to vector<8x32xf32>
      %45 = arith.subf %29, %44 : vector<8x32xf32>
      %cst_37 = arith.constant 9.99999974E-6 : f32
      %46 = vector.broadcast %cst_37 : f32 to vector<8x1xf32>
      %47 = arith.addf %43, %46 : vector<8x1xf32>
      %48 = math.rsqrt %47 : vector<8x1xf32>
      %49 = vector.broadcast %48 : vector<8x1xf32> to vector<8x32xf32>
      %50 = arith.mulf %45, %49 : vector<8x32xf32>
      %51 = vector.broadcast %31 : vector<1x32xf32> to vector<8x32xf32>
      %52 = arith.mulf %50, %51 : vector<8x32xf32>
      %53 = vector.broadcast %32 : vector<1x32xf32> to vector<8x32xf32>
      %54 = arith.addf %52, %53 : vector<8x32xf32>
      %55 = arith.truncf %54 : vector<8x32xf32> to vector<8x32xbf16>
      %c0_38 = arith.constant 0 : index
      %c0_39 = arith.constant 0 : index
      %56 = vector.load %arg17[%c0_38, %c0_39] : memref<8x32xbf16, #tpu.memory_space<vmem>>, vector<8x32xbf16>
      tpu.vector_store %arg17[%c0_38, %c0_39], %55 {strides = array<i32>} : memref<8x32xbf16, #tpu.memory_space<vmem>>, vector<8x32xbf16>,
      %cst_40 = arith.constant 0.000000e+00 : f32
      %57 = vector.broadcast %cst_40 : f32 to vector<8x32xf32>
      %c0_41 = arith.constant 0 : index
      %c0_42 = arith.constant 0 : index
      %58 = vector.load %arg18[%c0_41, %c0_42] : memref<8x32xf32, #tpu.memory_space<vmem>>, vector<8x32xf32>
      tpu.vector_store %arg18[%c0_41, %c0_42], %57 {strides = array<i32>} : memref<8x32xf32, #tpu.memory_space<vmem>>, vector<8x32xf32>,
    } else {
    }
    %c0 = arith.constant 0 : index
    %c0_1 = arith.constant 0 : index
    %3 = vector.load %arg17[%c0, %c0_1] : memref<8x32xbf16, #tpu.memory_space<vmem>>, vector<8x32xbf16>
    %c0_2 = arith.constant 0 : index
    %c0_3 = arith.constant 0 : index
    %4 = vector.load %arg9[%c0_2, %c0_3] : memref<32x128xbf16, #tpu.memory_space<vmem>>, vector<32x128xbf16>
    %cst = arith.constant dense<0.000000e+00> : vector<8x128xf32>
    %5 = tpu.matmul %3, %4, %cst {dimension_numbers = #tpu.dot_dimension_numbers<[1], [0], [0], [1], [0, 0, 1, 1], [], []>} : vector<8x32xbf16>, vector<32x128xbf16>, vector<8x128xf32> -> vector<8x128xf32>
    %c0_4 = arith.constant 0 : index
    %c0_5 = arith.constant 0 : index
    %6 = vector.load %arg10[%c0_4, %c0_5] : memref<1x128xf32, #tpu.memory_space<vmem>>, vector<1x128xf32>
    %7 = vector.broadcast %6 : vector<1x128xf32> to vector<8x128xf32>
    %8 = arith.addf %5, %7 : vector<8x128xf32>
    %cst_6 = arith.constant 0.000000e+00 : f32
    %9 = vector.broadcast %cst_6 : f32 to vector<8x128xf32>
    %10 = arith.maximumf %8, %9 : vector<8x128xf32>
    %c0_7 = arith.constant 0 : index
    %c0_8 = arith.constant 0 : index
    %11 = vector.load %arg18[%c0_7, %c0_8] : memref<8x32xf32, #tpu.memory_space<vmem>>, vector<8x32xf32>
    %12 = arith.truncf %10 : vector<8x128xf32> to vector<8x128xbf16>
    %c0_9 = arith.constant 0 : index
    %c0_10 = arith.constant 0 : index
    %13 = vector.load %arg11[%c0_9, %c0_10] : memref<128x32xbf16, #tpu.memory_space<vmem>>, vector<128x32xbf16>
    %cst_11 = arith.constant dense<0.000000e+00> : vector<8x32xf32>
    %14 = tpu.matmul %12, %13, %cst_11 {dimension_numbers = #tpu.dot_dimension_numbers<[1], [0], [0], [1], [0, 0, 1, 1], [], []>} : vector<8x128xbf16>, vector<128x32xbf16>, vector<8x32xf32> -> vector<8x32xf32>
    %15 = arith.addf %11, %14 : vector<8x32xf32>
    %c0_12 = arith.constant 0 : index
    %c0_13 = arith.constant 0 : index
    %16 = vector.load %arg18[%c0_12, %c0_13] : memref<8x32xf32, #tpu.memory_space<vmem>>, vector<8x32xf32>
    tpu.vector_store %arg18[%c0_12, %c0_13], %15 {strides = array<i32>} : memref<8x32xf32, #tpu.memory_space<vmem>>, vector<8x32xf32>,
    %c0_i32_14 = arith.constant 0 : i32
    %17 = arith.cmpi eq, %arg2, %c0_i32_14 : i32
    %18 = arith.extui %17 : i1 to i32
    %c0_i32_15 = arith.constant 0 : i32
    %19 = arith.cmpi ne, %18, %c0_i32_15 : i32
    scf.if %19 {
      %c0_16 = arith.constant 0 : index
      %c0_17 = arith.constant 0 : index
      %20 = vector.load %arg16[%c0_16, %c0_17] : memref<8x32xf32, #tpu.memory_space<vmem>>, vector<8x32xf32>
      %c0_18 = arith.constant 0 : index
      %c0_19 = arith.constant 0 : index
      %21 = vector.load %arg18[%c0_18, %c0_19] : memref<8x32xf32, #tpu.memory_space<vmem>>, vector<8x32xf32>
      %22 = arith.addf %20, %21 : vector<8x32xf32>
      %c0_20 = arith.constant 0 : index
      %c0_21 = arith.constant 0 : index
      %23 = vector.load %arg12[%c0_20, %c0_21] : memref<1x32xf32, #tpu.memory_space<vmem>>, vector<1x32xf32>
      %24 = vector.broadcast %23 : vector<1x32xf32> to vector<8x32xf32>
      %25 = arith.addf %22, %24 : vector<8x32xf32>
      %c0_22 = arith.constant 0 : index
      %c0_23 = arith.constant 0 : index
      %c0_24 = arith.constant 0 : index
      %26 = vector.load %arg15[%c0_22, %c0_23, %c0_24] : memref<1x8x32xf32, #tpu.memory_space<vmem>>, vector<1x8x32xf32>
      %27 = vector.shape_cast %26 : vector<1x8x32xf32> to vector<8x32xf32>
      %28 = vector.shape_cast %25 : vector<8x32xf32> to vector<1x8x32xf32>
      tpu.vector_store %arg15[%c0_22, %c0_23, %c0_24], %28 {strides = array<i32>} : memref<1x8x32xf32, #tpu.memory_space<vmem>>, vector<1x8x32xf32>,
    } else {
    }
    return
  }
  func.func @transform_0(%arg0: i32, %arg1: i32, %arg2: i32) -> (i32, i32, i32) {
    %c0_i32 = arith.constant 0 : i32
    %c0_i32_0 = arith.constant 0 : i32
    return %arg0, %arg1, %c0_i32 : i32, i32, i32
  }
  func.func @transform_1(%arg0: i32, %arg1: i32, %arg2: i32) -> (i32, i32, i32) {
    %c0_i32 = arith.constant 0 : i32
    %c0_i32_0 = arith.constant 0 : i32
    return %arg0, %arg1, %c0_i32 : i32, i32, i32
  }
  func.func @transform_2(%arg0: i32, %arg1: i32, %arg2: i32) -> (i32, i32) {
    %c0_i32 = arith.constant 0 : i32
    %c0_i32_0 = arith.constant 0 : i32
    %c0_i32_1 = arith.constant 0 : i32
    return %c0_i32, %c0_i32_0 : i32, i32
  }
  func.func @transform_3(%arg0: i32, %arg1: i32, %arg2: i32) -> (i32, i32) {
    %c0_i32 = arith.constant 0 : i32
    %c0_i32_0 = arith.constant 0 : i32
    %c0_i32_1 = arith.constant 0 : i32
    return %c0_i32, %c0_i32_0 : i32, i32
  }
  func.func @transform_4(%arg0: i32, %arg1: i32, %arg2: i32) -> (i32, i32) {
    %c0_i32 = arith.constant 0 : i32
    %c0_i32_0 = arith.constant 0 : i32
    %c0_i32_1 = arith.constant 0 : i32
    return %c0_i32, %c0_i32_0 : i32, i32
  }
  func.func @transform_5(%arg0: i32, %arg1: i32, %arg2: i32) -> (i32, i32) {
    %c0_i32 = arith.constant 0 : i32
    %c0_i32_0 = arith.constant 0 : i32
    %c0_i32_1 = arith.constant 0 : i32
    return %c0_i32, %c0_i32_0 : i32, i32
  }
  func.func @transform_6(%arg0: i32, %arg1: i32, %arg2: i32) -> (i32, i32) {
    %c0_i32 = arith.constant 0 : i32
    %c0_i32_0 = arith.constant 0 : i32
    return %c0_i32, %arg2 : i32, i32
  }
  func.func @transform_7(%arg0: i32, %arg1: i32, %arg2: i32) -> (i32, i32) {
    %c0_i32 = arith.constant 0 : i32
    %c0_i32_0 = arith.constant 0 : i32
    return %c0_i32, %arg2 : i32, i32
  }
  func.func @transform_8(%arg0: i32, %arg1: i32, %arg2: i32) -> (i32, i32) {
    %c0_i32 = arith.constant 0 : i32
    %c0_i32_0 = arith.constant 0 : i32
    return %arg2, %c0_i32 : i32, i32
  }
  func.func @transform_9(%arg0: i32, %arg1: i32, %arg2: i32) -> (i32, i32) {
    %c0_i32 = arith.constant 0 : i32
    %c0_i32_0 = arith.constant 0 : i32
    %c0_i32_1 = arith.constant 0 : i32
    return %c0_i32, %c0_i32_0 : i32, i32
  }
  func.func @transform_10(%arg0: i32, %arg1: i32, %arg2: i32) -> (i32, i32) {
    %c0_i32 = arith.constant 0 : i32
    %c0_i32_0 = arith.constant 0 : i32
    %c0_i32_1 = arith.constant 0 : i32
    return %c0_i32, %c0_i32_0 : i32, i32
  }
  func.func @transform_11(%arg0: i32, %arg1: i32, %arg2: i32) -> (i32, i32) {
    %c0_i32 = arith.constant 0 : i32
    %c0_i32_0 = arith.constant 0 : i32
    %c0_i32_1 = arith.constant 0 : i32
    return %c0_i32, %c0_i32_0 : i32, i32
  }
  func.func @transform_12(%arg0: i32, %arg1: i32, %arg2: i32) -> (i32, i32, i32) {
    %c0_i32 = arith.constant 0 : i32
    %c0_i32_0 = arith.constant 0 : i32
    return %arg0, %arg1, %c0_i32 : i32, i32, i32
  }
}

module attributes {stable_mosaic.version = 11 : i64} {
  func.func @proj_mlp_kernel(%arg0: i32, %arg1: i32, %arg2: i32, %arg3: memref<1x8x32xf32, #tpu.memory_space<vmem>>, %arg4: memref<1x8x32xbf16, #tpu.memory_space<vmem>>, %arg5: memref<32x32xbf16, #tpu.memory_space<vmem>>, %arg6: memref<1x32xf32, #tpu.memory_space<vmem>>, %arg7: memref<1x32xf32, #tpu.memory_space<vmem>>, %arg8: memref<1x32xf32, #tpu.memory_space<vmem>>, %arg9: memref<32x128xbf16, #tpu.memory_space<vmem>>, %arg10: memref<1x128xf32, #tpu.memory_space<vmem>>, %arg11: memref<128x32xbf16, #tpu.memory_space<vmem>>, %arg12: memref<1x32xf32, #tpu.memory_space<vmem>>, %arg13: memref<1x32xf32, #tpu.memory_space<vmem>>, %arg14: memref<1x32xf32, #tpu.memory_space<vmem>>, %arg15: memref<1x8x32xf32, #tpu.memory_space<vmem>>, %arg16: memref<8x32xf32, #tpu.memory_space<vmem>>, %arg17: memref<8x32xbf16, #tpu.memory_space<vmem>>, %arg18: memref<8x32xf32, #tpu.memory_space<vmem>>) attributes {dimension_semantics = [#tpu.dimension_semantics<parallel>, #tpu.dimension_semantics<parallel>, #tpu.dimension_semantics<arbitrary>], iteration_bounds = array<i64: 2, 1, 1>, scalar_prefetch = 0 : i64, scratch_operands = 3 : i64, tpu.core_type = #tpu.core_type<tc>, window_params = [{transform_indices = @transform_0, window_bounds = array<i64: 1, 8, 32>}, {transform_indices = @transform_1, window_bounds = array<i64: 1, 8, 32>}, {pipeline_mode = #tpu.pipeline_mode<synchronous>, transform_indices = @transform_2, window_bounds = array<i64: 32, 32>}, {pipeline_mode = #tpu.pipeline_mode<synchronous>, transform_indices = @transform_3, window_bounds = array<i64: 1, 32>}, {pipeline_mode = #tpu.pipeline_mode<synchronous>, transform_indices = @transform_4, window_bounds = array<i64: 1, 32>}, {pipeline_mode = #tpu.pipeline_mode<synchronous>, transform_indices = @transform_5, window_bounds = array<i64: 1, 32>}, {transform_indices = @transform_6, window_bounds = array<i64: 32, 128>}, {transform_indices = @transform_7, window_bounds = array<i64: 1, 128>}, {transform_indices = @transform_8, window_bounds = array<i64: 128, 32>}, {pipeline_mode = #tpu.pipeline_mode<synchronous>, transform_indices = @transform_9, window_bounds = array<i64: 1, 32>}, {pipeline_mode = #tpu.pipeline_mode<synchronous>, transform_indices = @transform_10, window_bounds = array<i64: 1, 32>}, {pipeline_mode = #tpu.pipeline_mode<synchronous>, transform_indices = @transform_11, window_bounds = array<i64: 1, 32>}, {transform_indices = @transform_12, window_bounds = array<i64: 1, 8, 32>}]} {
    %c0_i32 = arith.constant 0 : i32
    %0 = arith.cmpi eq, %arg2, %c0_i32 : i32
    %1 = arith.extui %0 : i1 to i32
    %c0_i32_0 = arith.constant 0 : i32
    %2 = arith.cmpi ne, %1, %c0_i32_0 : i32
    scf.if %2 {
      %c0_16 = arith.constant 0 : index
      %c0_17 = arith.constant 0 : index
      %c0_18 = arith.constant 0 : index
      %20 = vector.load %arg4[%c0_16, %c0_17, %c0_18] : memref<1x8x32xbf16, #tpu.memory_space<vmem>>, vector<1x8x32xbf16>
      %21 = vector.shape_cast %20 : vector<1x8x32xbf16> to vector<8x32xbf16>
      %c0_19 = arith.constant 0 : index
      %c0_20 = arith.constant 0 : index
      %22 = vector.load %arg5[%c0_19, %c0_20] : memref<32x32xbf16, #tpu.memory_space<vmem>>, vector<32x32xbf16>
      %cst_21 = arith.constant dense<0.000000e+00> : vector<8x32xf32>
      %23 = tpu.matmul %21, %22, %cst_21 {dimension_numbers = #tpu.dot_dimension_numbers<[1], [0], [0], [1], [0, 0, 1, 1], [], []>} : vector<8x32xbf16>, vector<32x32xbf16>, vector<8x32xf32> -> vector<8x32xf32>
      %c0_22 = arith.constant 0 : index
      %c0_23 = arith.constant 0 : index
      %24 = vector.load %arg6[%c0_22, %c0_23] : memref<1x32xf32, #tpu.memory_space<vmem>>, vector<1x32xf32>
      %25 = vector.broadcast %24 : vector<1x32xf32> to vector<8x32xf32>
      %26 = arith.addf %23, %25 : vector<8x32xf32>
      %c0_24 = arith.constant 0 : index
      %c0_25 = arith.constant 0 : index
      %c0_26 = arith.constant 0 : index
      %27 = vector.load %arg3[%c0_24, %c0_25, %c0_26] : memref<1x8x32xf32, #tpu.memory_space<vmem>>, vector<1x8x32xf32>
      %28 = vector.shape_cast %27 : vector<1x8x32xf32> to vector<8x32xf32>
      %29 = arith.addf %28, %26 : vector<8x32xf32>
      %c0_27 = arith.constant 0 : index
      %c0_28 = arith.constant 0 : index
      %30 = vector.load %arg16[%c0_27, %c0_28] : memref<8x32xf32, #tpu.memory_space<vmem>>, vector<8x32xf32>
      tpu.vector_store %arg16[%c0_27, %c0_28], %29 {strides = array<i32>} : memref<8x32xf32, #tpu.memory_space<vmem>>, vector<8x32xf32>,
      %c0_29 = arith.constant 0 : index
      %c0_30 = arith.constant 0 : index
      %31 = vector.load %arg7[%c0_29, %c0_30] : memref<1x32xf32, #tpu.memory_space<vmem>>, vector<1x32xf32>
      %c0_31 = arith.constant 0 : index
      %c0_32 = arith.constant 0 : index
      %32 = vector.load %arg8[%c0_31, %c0_32] : memref<1x32xf32, #tpu.memory_space<vmem>>, vector<1x32xf32>
      %cst_33 = arith.constant dense<0.000000e+00> : vector<8xf32>
      %33 = vector.multi_reduction <add>, %29, %cst_33 [1] : vector<8x32xf32> to vector<8xf32>
      %34 = vector.shape_cast %33 : vector<8xf32> to vector<8x1xf32>
      %cst_34 = arith.constant 3.200000e+01 : f32
      %35 = vector.broadcast %cst_34 : f32 to vector<8x1xf32>
      %36 = arith.divf %34, %35 : vector<8x1xf32>
      %37 = vector.broadcast %36 : vector<8x1xf32> to vector<8x32xf32>
      %38 = arith.subf %29, %37 : vector<8x32xf32>
      %39 = arith.mulf %38, %38 : vector<8x32xf32>
      %cst_35 = arith.constant dense<0.000000e+00> : vector<8xf32>
      %40 = vector.multi_reduction <add>, %39, %cst_35 [1] : vector<8x32xf32> to vector<8xf32>
      %41 = vector.shape_cast %40 : vector<8xf32> to vector<8x1xf32>
      %cst_36 = arith.constant 3.200000e+01 : f32
      %42 = vector.broadcast %cst_36 : f32 to vector<8x1xf32>
      %43 = arith.divf %41, %42 : vector<8x1xf32>
      %44 = vector.broadcast %36 : vector<8x1xf32> to vector<8x32xf32>
      %45 = arith.subf %29, %44 : vector<8x32xf32>
      %cst_37 = arith.constant 9.99999974E-6 : f32
      %46 = vector.broadcast %cst_37 : f32 to vector<8x1xf32>
      %47 = arith.addf %43, %46 : vector<8x1xf32>
      %48 = math.rsqrt %47 : vector<8x1xf32>
      %49 = vector.broadcast %48 : vector<8x1xf32> to vector<8x32xf32>
      %50 = arith.mulf %45, %49 : vector<8x32xf32>
      %51 = vector.broadcast %31 : vector<1x32xf32> to vector<8x32xf32>
      %52 = arith.mulf %50, %51 : vector<8x32xf32>
      %53 = vector.broadcast %32 : vector<1x32xf32> to vector<8x32xf32>
      %54 = arith.addf %52, %53 : vector<8x32xf32>
      %55 = arith.truncf %54 : vector<8x32xf32> to vector<8x32xbf16>
      %c0_38 = arith.constant 0 : index
      %c0_39 = arith.constant 0 : index
      %56 = vector.load %arg17[%c0_38, %c0_39] : memref<8x32xbf16, #tpu.memory_space<vmem>>, vector<8x32xbf16>
      tpu.vector_store %arg17[%c0_38, %c0_39], %55 {strides = array<i32>} : memref<8x32xbf16, #tpu.memory_space<vmem>>, vector<8x32xbf16>,
      %cst_40 = arith.constant 0.000000e+00 : f32
      %57 = vector.broadcast %cst_40 : f32 to vector<8x32xf32>
      %c0_41 = arith.constant 0 : index
      %c0_42 = arith.constant 0 : index
      %58 = vector.load %arg18[%c0_41, %c0_42] : memref<8x32xf32, #tpu.memory_space<vmem>>, vector<8x32xf32>
      tpu.vector_store %arg18[%c0_41, %c0_42], %57 {strides = array<i32>} : memref<8x32xf32, #tpu.memory_space<vmem>>, vector<8x32xf32>,
    } else {
    }
    %c0 = arith.constant 0 : index
    %c0_1 = arith.constant 0 : index
    %3 = vector.load %arg17[%c0, %c0_1] : memref<8x32xbf16, #tpu.memory_space<vmem>>, vector<8x32xbf16>
    %c0_2 = arith.constant 0 : index
    %c0_3 = arith.constant 0 : index
    %4 = vector.load %arg9[%c0_2, %c0_3] : memref<32x128xbf16, #tpu.memory_space<vmem>>, vector<32x128xbf16>
    %cst = arith.constant dense<0.000000e+00> : vector<8x128xf32>
    %5 = tpu.matmul %3, %4, %cst {dimension_numbers = #tpu.dot_dimension_numbers<[1], [0], [0], [1], [0, 0, 1, 1], [], []>} : vector<8x32xbf16>, vector<32x128xbf16>, vector<8x128xf32> -> vector<8x128xf32>
    %c0_4 = arith.constant 0 : index
    %c0_5 = arith.constant 0 : index
    %6 = vector.load %arg10[%c0_4, %c0_5] : memref<1x128xf32, #tpu.memory_space<vmem>>, vector<1x128xf32>
    %7 = vector.broadcast %6 : vector<1x128xf32> to vector<8x128xf32>
    %8 = arith.addf %5, %7 : vector<8x128xf32>
    %cst_6 = arith.constant 0.000000e+00 : f32
    %9 = vector.broadcast %cst_6 : f32 to vector<8x128xf32>
    %10 = arith.maximumf %8, %9 : vector<8x128xf32>
    %c0_7 = arith.constant 0 : index
    %c0_8 = arith.constant 0 : index
    %11 = vector.load %arg18[%c0_7, %c0_8] : memref<8x32xf32, #tpu.memory_space<vmem>>, vector<8x32xf32>
    %12 = arith.truncf %10 : vector<8x128xf32> to vector<8x128xbf16>
    %c0_9 = arith.constant 0 : index
    %c0_10 = arith.constant 0 : index
    %13 = vector.load %arg11[%c0_9, %c0_10] : memref<128x32xbf16, #tpu.memory_space<vmem>>, vector<128x32xbf16>
    %cst_11 = arith.constant dense<0.000000e+00> : vector<8x32xf32>
    %14 = tpu.matmul %12, %13, %cst_11 {dimension_numbers = #tpu.dot_dimension_numbers<[1], [0], [0], [1], [0, 0, 1, 1], [], []>} : vector<8x128xbf16>, vector<128x32xbf16>, vector<8x32xf32> -> vector<8x32xf32>
    %15 = arith.addf %11, %14 : vector<8x32xf32>
    %c0_12 = arith.constant 0 : index
    %c0_13 = arith.constant 0 : index
    %16 = vector.load %arg18[%c0_12, %c0_13] : memref<8x32xf32, #tpu.memory_space<vmem>>, vector<8x32xf32>
    tpu.vector_store %arg18[%c0_12, %c0_13], %15 {strides = array<i32>} : memref<8x32xf32, #tpu.memory_space<vmem>>, vector<8x32xf32>,
    %c0_i32_14 = arith.constant 0 : i32
    %17 = arith.cmpi eq, %arg2, %c0_i32_14 : i32
    %18 = arith.extui %17 : i1 to i32
    %c0_i32_15 = arith.constant 0 : i32
    %19 = arith.cmpi ne, %18, %c0_i32_15 : i32
    scf.if %19 {
      %c0_16 = arith.constant 0 : index
      %c0_17 = arith.constant 0 : index
      %20 = vector.load %arg16[%c0_16, %c0_17] : memref<8x32xf32, #tpu.memory_space<vmem>>, vector<8x32xf32>
      %c0_18 = arith.constant 0 : index
      %c0_19 = arith.constant 0 : index
      %21 = vector.load %arg18[%c0_18, %c0_19] : memref<8x32xf32, #tpu.memory_space<vmem>>, vector<8x32xf32>
      %22 = arith.addf %20, %21 : vector<8x32xf32>
      %c0_20 = arith.constant 0 : index
      %c0_21 = arith.constant 0 : index
      %23 = vector.load %arg12[%c0_20, %c0_21] : memref<1x32xf32, #tpu.memory_space<vmem>>, vector<1x32xf32>
      %24 = vector.broadcast %23 : vector<1x32xf32> to vector<8x32xf32>
      %25 = arith.addf %22, %24 : vector<8x32xf32>
      %c0_22 = arith.constant 0 : index
      %c0_23 = arith.constant 0 : index
      %26 = vector.load %arg13[%c0_22, %c0_23] : memref<1x32xf32, #tpu.memory_space<vmem>>, vector<1x32xf32>
      %c0_24 = arith.constant 0 : index
      %c0_25 = arith.constant 0 : index
      %27 = vector.load %arg14[%c0_24, %c0_25] : memref<1x32xf32, #tpu.memory_space<vmem>>, vector<1x32xf32>
      %cst_26 = arith.constant dense<0.000000e+00> : vector<8xf32>
      %28 = vector.multi_reduction <add>, %25, %cst_26 [1] : vector<8x32xf32> to vector<8xf32>
      %29 = vector.shape_cast %28 : vector<8xf32> to vector<8x1xf32>
      %cst_27 = arith.constant 3.200000e+01 : f32
      %30 = vector.broadcast %cst_27 : f32 to vector<8x1xf32>
      %31 = arith.divf %29, %30 : vector<8x1xf32>
      %32 = vector.broadcast %31 : vector<8x1xf32> to vector<8x32xf32>
      %33 = arith.subf %25, %32 : vector<8x32xf32>
      %34 = arith.mulf %33, %33 : vector<8x32xf32>
      %cst_28 = arith.constant dense<0.000000e+00> : vector<8xf32>
      %35 = vector.multi_reduction <add>, %34, %cst_28 [1] : vector<8x32xf32> to vector<8xf32>
      %36 = vector.shape_cast %35 : vector<8xf32> to vector<8x1xf32>
      %cst_29 = arith.constant 3.200000e+01 : f32
      %37 = vector.broadcast %cst_29 : f32 to vector<8x1xf32>
      %38 = arith.divf %36, %37 : vector<8x1xf32>
      %39 = vector.broadcast %31 : vector<8x1xf32> to vector<8x32xf32>
      %40 = arith.subf %25, %39 : vector<8x32xf32>
      %cst_30 = arith.constant 9.99999974E-6 : f32
      %41 = vector.broadcast %cst_30 : f32 to vector<8x1xf32>
      %42 = arith.addf %38, %41 : vector<8x1xf32>
      %43 = math.rsqrt %42 : vector<8x1xf32>
      %44 = vector.broadcast %43 : vector<8x1xf32> to vector<8x32xf32>
      %45 = arith.mulf %40, %44 : vector<8x32xf32>
      %46 = vector.broadcast %26 : vector<1x32xf32> to vector<8x32xf32>
      %47 = arith.mulf %45, %46 : vector<8x32xf32>
      %48 = vector.broadcast %27 : vector<1x32xf32> to vector<8x32xf32>
      %49 = arith.addf %47, %48 : vector<8x32xf32>
      %c0_31 = arith.constant 0 : index
      %c0_32 = arith.constant 0 : index
      %c0_33 = arith.constant 0 : index
      %50 = vector.load %arg15[%c0_31, %c0_32, %c0_33] : memref<1x8x32xf32, #tpu.memory_space<vmem>>, vector<1x8x32xf32>
      %51 = vector.shape_cast %50 : vector<1x8x32xf32> to vector<8x32xf32>
      %52 = vector.shape_cast %49 : vector<8x32xf32> to vector<1x8x32xf32>
      tpu.vector_store %arg15[%c0_31, %c0_32, %c0_33], %52 {strides = array<i32>} : memref<1x8x32xf32, #tpu.memory_space<vmem>>, vector<1x8x32xf32>,
    } else {
    }
    return
  }
  func.func @transform_0(%arg0: i32, %arg1: i32, %arg2: i32) -> (i32, i32, i32) {
    %c0_i32 = arith.constant 0 : i32
    %c0_i32_0 = arith.constant 0 : i32
    return %arg0, %arg1, %c0_i32 : i32, i32, i32
  }
  func.func @transform_1(%arg0: i32, %arg1: i32, %arg2: i32) -> (i32, i32, i32) {
    %c0_i32 = arith.constant 0 : i32
    %c0_i32_0 = arith.constant 0 : i32
    return %arg0, %arg1, %c0_i32 : i32, i32, i32
  }
  func.func @transform_2(%arg0: i32, %arg1: i32, %arg2: i32) -> (i32, i32) {
    %c0_i32 = arith.constant 0 : i32
    %c0_i32_0 = arith.constant 0 : i32
    %c0_i32_1 = arith.constant 0 : i32
    return %c0_i32, %c0_i32_0 : i32, i32
  }
  func.func @transform_3(%arg0: i32, %arg1: i32, %arg2: i32) -> (i32, i32) {
    %c0_i32 = arith.constant 0 : i32
    %c0_i32_0 = arith.constant 0 : i32
    %c0_i32_1 = arith.constant 0 : i32
    return %c0_i32, %c0_i32_0 : i32, i32
  }
  func.func @transform_4(%arg0: i32, %arg1: i32, %arg2: i32) -> (i32, i32) {
    %c0_i32 = arith.constant 0 : i32
    %c0_i32_0 = arith.constant 0 : i32
    %c0_i32_1 = arith.constant 0 : i32
    return %c0_i32, %c0_i32_0 : i32, i32
  }
  func.func @transform_5(%arg0: i32, %arg1: i32, %arg2: i32) -> (i32, i32) {
    %c0_i32 = arith.constant 0 : i32
    %c0_i32_0 = arith.constant 0 : i32
    %c0_i32_1 = arith.constant 0 : i32
    return %c0_i32, %c0_i32_0 : i32, i32
  }
  func.func @transform_6(%arg0: i32, %arg1: i32, %arg2: i32) -> (i32, i32) {
    %c0_i32 = arith.constant 0 : i32
    %c0_i32_0 = arith.constant 0 : i32
    return %c0_i32, %arg2 : i32, i32
  }
  func.func @transform_7(%arg0: i32, %arg1: i32, %arg2: i32) -> (i32, i32) {
    %c0_i32 = arith.constant 0 : i32
    %c0_i32_0 = arith.constant 0 : i32
    return %c0_i32, %arg2 : i32, i32
  }
  func.func @transform_8(%arg0: i32, %arg1: i32, %arg2: i32) -> (i32, i32) {
    %c0_i32 = arith.constant 0 : i32
    %c0_i32_0 = arith.constant 0 : i32
    return %arg2, %c0_i32 : i32, i32
  }
  func.func @transform_9(%arg0: i32, %arg1: i32, %arg2: i32) -> (i32, i32) {
    %c0_i32 = arith.constant 0 : i32
    %c0_i32_0 = arith.constant 0 : i32
    %c0_i32_1 = arith.constant 0 : i32
    return %c0_i32, %c0_i32_0 : i32, i32
  }
  func.func @transform_10(%arg0: i32, %arg1: i32, %arg2: i32) -> (i32, i32) {
    %c0_i32 = arith.constant 0 : i32
    %c0_i32_0 = arith.constant 0 : i32
    %c0_i32_1 = arith.constant 0 : i32
    return %c0_i32, %c0_i32_0 : i32, i32
  }
  func.func @transform_11(%arg0: i32, %arg1: i32, %arg2: i32) -> (i32, i32) {
    %c0_i32 = arith.constant 0 : i32
    %c0_i32_0 = arith.constant 0 : i32
    %c0_i32_1 = arith.constant 0 : i32
    return %c0_i32, %c0_i32_0 : i32, i32
  }
  func.func @transform_12(%arg0: i32, %arg1: i32, %arg2: i32) -> (i32, i32, i32) {
    %c0_i32 = arith.constant 0 : i32
    %c0_i32_0 = arith.constant 0 : i32
    return %arg0, %arg1, %c0_i32 : i32, i32, i32
  }
}

</mosaic_0001>

<bundles_post_ra>
// kernel: gpt2_forward.6
= control target key start
LH: loop header
LB: loop body
LE: loop exit
PB: predicated region body
PF: predicated region fallthrough
CT: control target
= control target key end

     0   :  { %s742_s24 = smov 0   ;;  %s744_s25 = smov 0   ;;  %s803_s0 = inlined_call_operand.vmem [shape: f32[2,8,32], index: 0, kind: input, shape index: {}]   ;;  %s804_s1 = inlined_call_operand.vmem [shape: f32[1,32], index: 1, kind: input, shape index: {}]   ;;  %s805_s2 = inlined_call_operand.vmem [shape: f32[1,32], index: 2, kind: input, shape index: {}]   ;;  %s806_s3 = inlined_call_operand.vmem [shape: bf16[32,96], index: 3, kind: input, shape index: {}]   ;;  %s807_s4 = inlined_call_operand.vmem [shape: f32[1,96], index: 4, kind: input, shape index: {}]   ;;  %s808_s5 = inlined_call_operand.vmem [shape: bf16[2,8,32], index: 5, kind: output, shape index: {0}]   ;;  %s809_s6 = inlined_call_operand.vmem [shape: bf16[2,8,32], index: 6, kind: output, shape index: {1}]   ;;  %s810_s7 = inlined_call_operand.vmem [shape: bf16[2,8,32], index: 7, kind: output, shape index: {2}]  }
   0x1   :  { %s746_s26 = smov 0  }
   0x2 LB: > { %s30_s27 = sadd.s32 1, %s692_s25  ;;  %p616_p0 = scmp.ge.s32.totalorder %s696_s26, 1  ;;  %s696_s26 = sphi %s746_s26, %s18_s26   ;;  %s692_s25 = sphi %s744_s25, %s812_s25   ;;  %s688_s24 = sphi %s742_s24, %s811_s24  }
   0x3   : > { %p32_p1 = scmp.ge.s32.totalorder %s30_s27, 2  ;;  %p264_p2 = scmp.lt.s32.totalorder %s696_s26, 3 }
   0x5   : > { %s814_s27 = smov (%p32_p1, %s30_s27), 0  ;;  %p265_p3 = pnand %p616_p0, %p264_p2 }
   0x6   : > { %p314_p4 = scmp.lt.s32.totalorder (!%p265_p3), %s688_s24, 1  ;;  %s700_s23 = smov (!%p265_p3), 96  }
   0x7   : > { %268 = sbr.rel (%p265_p3) target bundleno = 643 (0x283), region = 40 }
   0xc   : > { %s816_s24 = smov (!%p314_p4, %s688_s24), 1  ;;  %vm346_vm0 = vcmask 261120   ;;  %v670_v7 = vld [vmem:[%s806_s3 + $0x8] sm:$0xff]   ;;  %v698_v8 = vmov 0.0   ;;  %vm699_vm1 = vmmov 0   ;;  %v671_v9 = vld [vmem:[%s806_s3] sm:$0xff]  }
   0xd   : > { %s617_s28 = sshll.u32 %s816_s24, 3  ;;  %634 = vmatprep.subr.bf16.mxu0 %v698_v8  ;;  %638 = vmatprep.mubr.msk.bf16.mxu0 %vm699_vm1, %v698_v8  ;;  %v621_v14 = vld [vmem:[%s804_s1] ss:$0 sm:$0xff]  ;;  %s618_s19 = sshll.u32 %s816_s24, 2  ;;  %vm443_vm2 = vcmask 257024  }
   0xe   : > { %s320_s8 = scalar_lea.vmem %s803_s0, %s617_s28  ;;  %635 = vmatpush3.bf16.msra.mxu0 %v670_v7  ;;  %v622_v16 = vld [vmem:[%s805_s2] ss:$0 sm:$0xff]  ;;  %s327_s22 = scalar_lea.vmem %s808_s5, %s618_s19 }
   0xf   : > { %v343_v0 = vld [vmem:[%s320_s8] sm:$0xff]  ;;  %636 = vmatprep.subr.bf16.mxu0 %v698_v8  ;;  %s701_s28 = smov 64   ;;  %s334_s24 = scalar_lea.vmem %s809_s6, %s618_s19 }
  0x10   : > { %v347_v1 = vsel %vm346_vm0, %v343_v0, 0.0  ;;  %v623_v20 = vld [vmem:[%s807_s4] ss:$0 sm:$0xff]  ;;  %s341_s10 = scalar_lea.vmem %s810_s7, %s618_s19 }
  0x11   : > { %348 = vadd.xlane.f32.xlu0 %v347_v1 }
  0x12   : > { %637 = vmatpush3.bf16.msra.mxu0 %v671_v9 }
  0x9a   : > { %v349_v2 = vpop.xlane.xlu0 %348 }
  0x9b   : > { %v351_v3 = vmul.f32 0.03125, %v349_v2 }
  0x9d   : > { %v352_v4 = vsub.f32 %v343_v0, %v351_v3 }
  0x9f   : > { %v353_v5 = vmul.f32 %v352_v4, %v352_v4 }
  0xa1   : > { %v354_v6 = vsel %vm346_vm0, %v353_v5, 0.0 }
  0xa2   : > { %355 = vadd.xlane.f32.xlu0 %v354_v6 }
 0x12b   : > { %v356_v10 = vpop.xlane.xlu0 %355 }
 0x12c   : > { %v357_v11 = vmul.f32 0.03125, %v356_v10 }
 0x12e   : > { %v358_v12 = vadd.f32 1e-05, %v357_v11 }
 0x130   : > { %672 = vrsqrt.f32 %v358_v12 }
 0x13d   : > { %v673_v13 = vpop.eup %672 }
 0x13e   : > { %v360_v15 = vmul.f32 %v673_v13, %v352_v4 }
 0x140   : > { %v367_v17 = vmul.f32 %v621_v14, %v360_v15 }
 0x142   : > { %v374_v18 = vadd.f32 %v622_v16, %v367_v17 }
 0x144   : > { %v375_v19 = vpack.c.bf16 %v374_v18, %v374_v18 }
 0x146   : > { %639 = vmatmul.mubr.msk.bf16.vlgmr.msra.gmra.mxu0 %vm346_vm0, %v375_v19 }
 0x206   : > { %v436_v21 = vpop.f32.mrf.mxu0 }
 0x207   : > { %v437_v22 = vadd.f32 %v623_v20, %v436_v21 }
 0x208   : > { %v640_v23 = vpop.f32.mrf.mxu0 }
 0x209   : > { %v442_v24 = vpack.c.bf16 %v437_v22, %v437_v22 }
 0x20a   : > { %v439_v25 = vpop.f32.mrf.mxu0 }
 0x20b   : > { %448 = vrot.lane.b32.xlu1 %v442_v24, %s700_s23  ;;  %444 = vst.msk [vmem:[%s327_s22] sm:$0xf] %vm443_vm2, %v442_v24 }
 0x20c   : > { %v641_v26 = vpop.f32.mrf.mxu0 }
 0x20f   : > { %452 = vrot.lane.b32.xlu1 %v442_v24, %s701_s28 }
 0x27d   : > { %v449_v27 = vpop.permute.xlu1 %448 }
 0x27e   : > { %451 = vst.msk [vmem:[%s334_s24] sm:$0xf] %vm443_vm2, %v449_v27 }
 0x281   : > { %v453_v28 = vpop.permute.xlu1 %452 }
 0x282   : > { %455 = vst.msk [vmem:[%s341_s10] sm:$0xf] %vm443_vm2, %v453_v28 }
 0x283 PF: > { %s18_s26 = sadd.s32 1, %s696_s26   ;;  %s811_s24 = smov %s692_s25 }
 0x284   : > { %p15_p5 = scmp.ge.s32.totalorder %s18_s26, 4   ;;  %s812_s25 = smov %s814_s27 }
 0x286   :  { %17 = sbr.rel (!%p15_p5) target bundleno = 2 (0x2), region = 94 }

// kernel: gpt2_forward.7
= control target key start
LH: loop header
LB: loop body
LE: loop exit
PB: predicated region body
PF: predicated region fallthrough
CT: control target
= control target key end

     0   :  { %s1274_s15 = smov 0   ;;  %s1276_s16 = smov 0   ;;  %s1463_s0 = inlined_call_operand.vmem [shape: bf16[2,4,8,8], index: 0, kind: input, shape index: {}]   ;;  %s1464_s1 = inlined_call_operand.vmem [shape: bf16[2,4,8,8], index: 1, kind: input, shape index: {}]   ;;  %s1465_s2 = inlined_call_operand.vmem [shape: bf16[2,4,8,8], index: 2, kind: input, shape index: {}]   ;;  %s1466_s3 = inlined_call_operand.vmem [shape: f32[2,1,8], index: 3, kind: input, shape index: {}]   ;;  %s1467_s4 = inlined_call_operand.vmem [shape: bf16[2,4,8,8], index: 4, kind: output, shape index: {}]  }
   0x1   :  { %s1278_s17 = smov 0  }
   0x2 LB: > { %s33_s18 = sadd.s32 1, %s1239_s16  ;;  %p1079_p0 = scmp.ge.s32.totalorder %s1243_s17, 1  ;;  %s1243_s17 = sphi %s1278_s17, %s14_s17   ;;  %s1239_s16 = sphi %s1276_s16, %s1469_s16   ;;  %s1235_s15 = sphi %s1274_s15, %s1468_s15  }
   0x3   : > { %p35_p1 = scmp.ge.s32.totalorder %s33_s18, 2  ;;  %p231_p2 = scmp.lt.s32.totalorder %s1243_s17, 3 }
   0x5   : > { %s1471_s18 = smov (%p35_p1, %s33_s18), 0  ;;  %p232_p3 = pnand %p1079_p0, %p231_p2 }
   0x6   : > { %p285_p4 = scmp.lt.s32.totalorder (!%p232_p3), %s1235_s15, 1 }
   0x7   : > { %235 = sbr.rel (%p232_p3) target bundleno = 811 (0x32b), region = 36 }
   0xc   : > { %vm337_vm0 = vcmask 64512   ;;  %v1245_v0 = vmov 0.0   ;;  %s1473_s15 = smov (!%p285_p4, %s1235_s15), 1  ;;  %vm1246_vm1 = vmmov 0   ;;  %vm328_vm2 = vcmask 7168  }
   0xd   : > { %1119 = vmatprep.subr.bf16.mxu0 %v1245_v0  ;;  %1125 = vmatprep.subr.bf16.mxu1 %v1245_v0  ;;  %338 = vst.msk [vmem:[#allocation4] sm:$0xff] %vm337_vm0, %v1245_v0  ;;  %339 = vst.msk [vmem:[#allocation4 + $0x8] sm:$0xff] %vm337_vm0, %v1245_v0  ;;  %s1309_s19 = sshll.u32 %s1473_s15, 4  ;;  %v1247_v13 = vmov -inf   ;;  %v544_v14 = vlaneseq  ;;  %s314_s28 = scalar_lea.vmem %s1466_s3, %s1473_s15  ;;  %v1248_v50 = vmov 0   ;;  %vm699_vm4 = vcmask 1043456  }
   0xe   : > { %340 = vst.msk [vmem:[#allocation4 + $0x10] sm:$0xff] %vm337_vm0, %v1245_v0  ;;  %341 = vst.msk [vmem:[#allocation4 + $0x18] sm:$0xff] %vm337_vm0, %v1245_v0  ;;  %1121 = vmatprep.mubr.msk.bf16.mxu0 %vm1246_vm1, %v1245_v0  ;;  %1127 = vmatprep.mubr.msk.bf16.mxu1 %vm1246_vm1, %v1245_v0  ;;  %s300_s22 = scalar_lea.vmem %s1464_s1, %s1309_s19  ;;  %s292_s25 = scalar_lea.vmem %s1463_s0, %s1309_s19  ;;  %v1092_v21 = vld [vmem:[%s314_s28] ss:$0 sm:$0xff]  ;;  %vm936_vm5 = vcmask 60416  }
   0xf   : > { %v346_v1 = vld [vmem:[%s300_s22] sm:$0xf]  ;;  %v347_v2 = vld [vmem:[%s300_s22 + $0x4] sm:$0xf]  ;;  %v348_v5 = vld [vmem:[%s300_s22 + $0x8] sm:$0xf]  ;;  %1195 = vset.pattern.permute.xlu0 %v1248_v50  ;;  %1196 = vset.pattern.permute.xlu1 %v1248_v50  ;;  %s308_s5 = scalar_lea.vmem %s1465_s2, %s1309_s19  ;;  %s322_s8 = scalar_lea.vmem %s1467_s4, %s1309_s19 }
  0x10   : > { %v359_v3 = vsel %vm337_vm0, %v346_v1, 0  ;;  %v405_v4 = vsel %vm337_vm0, %v347_v2, 0  ;;  %v349_v6 = vld [vmem:[%s300_s22 + $0xc] sm:$0xf]  ;;  %v342_v7 = vld [vmem:[%s292_s25] sm:$0xf] }
  0x11   : > { %1120 = vmatpush3.bf16.xpose.msra.mxu0 %v359_v3  ;;  %1126 = vmatpush3.bf16.xpose.msra.mxu1 %v405_v4  ;;  %v343_v8 = vld [vmem:[%s292_s25 + $0x4] sm:$0xf]  ;;  %v451_v9 = vsel %vm337_vm0, %v348_v5, 0  ;;  %v497_v10 = vsel %vm337_vm0, %v349_v6, 0  ;;  %v344_v11 = vld [vmem:[%s292_s25 + $0x8] sm:$0xf] }
  0x12   : > { %1131 = vmatprep.subr.bf16.mxu0 %v1245_v0  ;;  %1137 = vmatprep.subr.bf16.mxu1 %v1245_v0  ;;  %v345_v12 = vld [vmem:[%s292_s25 + $0xc] sm:$0xf]  ;;  %329 = vst.msk [vmem:[#allocation2] sm:$0xff] %vm328_vm2, %v1247_v13  ;;  %330 = vst.msk [vmem:[#allocation2 + $0x8] sm:$0xff] %vm328_vm2, %v1247_v13  ;;  %v545_v15 = vshrl.u32 %v544_v14, 7  ;;  %v550_v16 = vand.u32 127, %v544_v14 }
  0x13   : > { %331 = vst.msk [vmem:[#allocation2 + $0x10] sm:$0xff] %vm328_vm2, %v1247_v13  ;;  %332 = vst.msk [vmem:[#allocation2 + $0x18] sm:$0xff] %vm328_vm2, %v1247_v13  ;;  %v350_v3 = vld [vmem:[%s308_s5] sm:$0xf]  ;;  %v351_v6 = vld [vmem:[%s308_s5 + $0x4] sm:$0xf] }
  0x14   : > { %333 = vst.msk [vmem:[#allocation3] sm:$0xff] %vm328_vm2, %v1245_v0  ;;  %334 = vst.msk [vmem:[#allocation3 + $0x8] sm:$0xff] %vm328_vm2, %v1245_v0  ;;  %vm553_vm3 = vcmp.le.s32.totalorder %v550_v16, %v545_v15  ;;  %v701_v5 = vsel %vm699_vm4, %v350_v3, 0  ;;  %v665_v3 = vld [vmem:[#allocation4 + $0x8] sm:$0xff] }
  0x15   : > { %335 = vst.msk [vmem:[#allocation3 + $0x10] sm:$0xff] %vm328_vm2, %v1245_v0  ;;  %336 = vst.msk [vmem:[#allocation3 + $0x18] sm:$0xff] %vm328_vm2, %v1245_v0 }
  0x18   : > { %1122 = vmatmul.mubr.msk.bf16.vlgmr.msra.gmra.mxu0 %vm337_vm0, %v342_v7  ;;  %1128 = vmatmul.mubr.msk.bf16.vlgmr.msra.gmra.mxu1 %vm337_vm0, %v343_v8  ;;  %v747_v7 = vsel %vm699_vm4, %v351_v6, 0  ;;  %v352_v8 = vld [vmem:[%s308_s5 + $0x8] sm:$0xf] }
  0x19   : > { %1132 = vmatpush3.bf16.xpose.msra.mxu0 %v451_v9  ;;  %1138 = vmatpush3.bf16.xpose.msra.mxu1 %v497_v10  ;;  %v1369_v51 = vld [vmem:[#allocation2] sm:$0xff]  ;;  %v1374_v54 = vld [vmem:[#allocation2 + $0x8] sm:$0xff]  ;;  %v793_v9 = vsel %vm699_vm4, %v352_v8, 0 }
  0x1a   : > { %1133 = vmatprep.mubr.msk.bf16.mxu0 %vm1246_vm1, %v1245_v0  ;;  %1139 = vmatprep.mubr.msk.bf16.mxu1 %vm1246_vm1, %v1245_v0  ;;  %v1384_v58 = vld [vmem:[#allocation2 + $0x10] sm:$0xff]  ;;  %v1394_v62 = vld [vmem:[#allocation2 + $0x18] sm:$0xff]  ;;  %v353_v10 = vld [vmem:[%s308_s5 + $0xc] sm:$0xf] }
  0x1b   : > { %1143 = vmatprep.subr.bf16.mxu0 %v1245_v0  ;;  %1149 = vmatprep.subr.bf16.mxu1 %v1245_v0 }
  0x20   : > { %1134 = vmatmul.mubr.msk.bf16.vlgmr.msra.gmra.mxu0 %vm337_vm0, %v344_v11  ;;  %1140 = vmatmul.mubr.msk.bf16.vlgmr.msra.gmra.mxu1 %vm337_vm0, %v345_v12  ;;  %v839_v11 = vsel %vm699_vm4, %v353_v10, 0 }
  0x21   : > { %1145 = vmatprep.mubr.msk.bf16.mxu0 %vm1246_vm1, %v1245_v0  ;;  %1151 = vmatprep.mubr.msk.bf16.mxu1 %vm1246_vm1, %v1245_v0 }
  0x22   : > { %1144 = vmatpush3.bf16.msra.mxu0 %v701_v5  ;;  %1150 = vmatpush3.bf16.msra.mxu1 %v747_v7 }
  0x23   : > { %1155 = vmatprep.subr.bf16.mxu0 %v1245_v0  ;;  %1161 = vmatprep.subr.bf16.mxu1 %v1245_v0 }
  0xd8   : > { %v395_v17 = vpop.f32.mrf.mxu0  ;;  %v441_v18 = vpop.f32.mrf.mxu1 }
  0xd9   : > { %v539_v19 = vmul.f32 0.35355338, %v395_v17  ;;  %v540_v20 = vmul.f32 0.35355338, %v441_v18 }
  0xda   : > { %v1123_v22 = vpop.f32.mrf.mxu0  ;;  %v1129_v23 = vpop.f32.mrf.mxu1 }
  0xdb   : > { %v556_v24 = vsel %vm553_vm3, %v539_v19, -10000.0  ;;  %v557_v25 = vsel %vm553_vm3, %v540_v20, -10000.0 }
  0xdc   : > { %v398_v26 = vpop.f32.mrf.mxu0  ;;  %v444_v27 = vpop.f32.mrf.mxu1  ;;  %v1357_v28 = vadd.f32 %v1092_v21, %v556_v24  ;;  %v1359_v29 = vadd.f32 %v1092_v21, %v557_v25 }
  0xde   : > { %v1124_v30 = vpop.f32.mrf.mxu0  ;;  %v1130_v31 = vpop.f32.mrf.mxu1  ;;  %v575_v32 = vsel %vm337_vm0, %v1357_v28, -inf  ;;  %v578_v35 = vsel %vm337_vm0, %v1359_v29, -inf }
  0xdf   : > { %576 = vmax.xlane.f32.xlu0 %v575_v32 }
  0xe0   : > { %v487_v33 = vpop.f32.mrf.mxu0  ;;  %v533_v34 = vpop.f32.mrf.mxu1 }
  0xe1   : > { %v541_v36 = vmul.f32 0.35355338, %v487_v33  ;;  %v542_v37 = vmul.f32 0.35355338, %v533_v34 }
  0xe2   : > { %v1135_v38 = vpop.f32.mrf.mxu0  ;;  %v1141_v39 = vpop.f32.mrf.mxu1 }
  0xe3   : > { %v558_v40 = vsel %vm553_vm3, %v541_v36, -10000.0  ;;  %v559_v41 = vsel %vm553_vm3, %v542_v37, -10000.0  ;;  %579 = vmax.xlane.f32.xlu0 %v578_v35 }
  0xe4   : > { %v490_v42 = vpop.f32.mrf.mxu0  ;;  %v536_v43 = vpop.f32.mrf.mxu1  ;;  %v569_v44 = vadd.f32 %v1092_v21, %v558_v40  ;;  %v570_v45 = vadd.f32 %v1092_v21, %v559_v41  ;;  %v635_v41 = vld [vmem:[#allocation3] sm:$0xff] }
  0xe6   : > { %v1136_v46 = vpop.f32.mrf.mxu0  ;;  %v1142_v47 = vpop.f32.mrf.mxu1  ;;  %v581_v48 = vsel %vm337_vm0, %v569_v44, -inf  ;;  %v584_v49 = vsel %vm337_vm0, %v570_v45, -inf }
  0xe7   : > { %582 = vmax.xlane.f32.xlu1 %v581_v48 }
  0xeb   : > { %585 = vmax.xlane.f32.xlu1 %v584_v49  ;;  %v637_v49 = vld [vmem:[#allocation3 + $0x10] sm:$0xff] }
 0x168   : > { %v577_v52 = vpop.xlane.xlu0 %576 }
 0x169   : > { %v1372_v53 = vmax.f32 %v1369_v51, %v577_v52 }
 0x16b   : > { %v591_v55 = vsub.f32 %v1369_v51, %v1372_v53  ;;  %889 = vst.msk [vmem:[#allocation2] sm:$0xff] %vm328_vm2, %v1372_v53  ;;  %605 = vperm.xlu0 %1195, %v1372_v53  }
 0x16c   : > { %v580_v56 = vpop.xlane.xlu0 %579 }
 0x16d   : > { %v1382_v57 = vmax.f32 %v1374_v54, %v580_v56  ;;  %v595_v35 = vmul.f32 1.442695, %v591_v55 }
 0x16f   : > { %v592_v59 = vsub.f32 %v1374_v54, %v1382_v57  ;;  %890 = vst.msk [vmem:[#allocation2 + $0x8] sm:$0xff] %vm328_vm2, %v1382_v57  ;;  %610 = vperm.xlu1 %1196, %v1382_v57   ;;  %v638_v54 = vld [vmem:[#allocation3 + $0x18] sm:$0xff] }
 0x170   : > { %v583_v60 = vpop.xlane.xlu1 %582 }
 0x171   : > { %v1392_v61 = vmax.f32 %v1384_v58, %v583_v60  ;;  %v597_v33 = vmul.f32 1.442695, %v592_v59 }
 0x173   : > { %v593_v63 = vsub.f32 %v1384_v58, %v1392_v61  ;;  %891 = vst.msk [vmem:[#allocation2 + $0x10] sm:$0xff] %vm328_vm2, %v1392_v61  ;;  %615 = vperm.xlu1 %1196, %v1392_v61  }
 0x174   : > { %v586_v1 = vpop.xlane.xlu1 %585 }
 0x175   : > { %v1402_v2 = vmax.f32 %v1394_v62, %v586_v1  ;;  %v599_v39 = vmul.f32 1.442695, %v593_v63  ;;  %v664_v63 = vld [vmem:[#allocation4] sm:$0xff] }
 0x177   : > { %v594_v4 = vsub.f32 %v1394_v62, %v1402_v2  ;;  %892 = vst.msk [vmem:[#allocation2 + $0x18] sm:$0xff] %vm328_vm2, %v1402_v2  ;;  %620 = vperm.xlu1 %1196, %v1402_v2  }
 0x179   : > { %v601_v40 = vmul.f32 1.442695, %v594_v4 }
 0x1e6   : > { %v606_v12 = vpop.permute.xlu0 %605 }
 0x1e7   : > { %v623_v13 = vsub.f32 %v1357_v28, %v606_v12 }
 0x1e9   : > { %v627_v14 = vmul.f32 1.442695, %v623_v13 }
 0x1ea   : > { %v611_v15 = vpop.permute.xlu1 %610 }
 0x1eb   : > { %1197 = vpow2.f32 %v627_v14  ;;  %v624_v16 = vsub.f32 %v1359_v29, %v611_v15 }
 0x1ed   : > { %v629_v17 = vmul.f32 1.442695, %v624_v16 }
 0x1ee   : > { %v616_v18 = vpop.permute.xlu1 %615 }
 0x1ef   : > { %1199 = vpow2.f32 %v629_v17  ;;  %v625_v19 = vsub.f32 %v569_v44, %v616_v18  ;;  %v636_v44 = vld [vmem:[#allocation3 + $0x8] sm:$0xff] }
 0x1f1   : > { %v631_v20 = vmul.f32 1.442695, %v625_v19 }
 0x1f2   : > { %v621_v21 = vpop.permute.xlu1 %620 }
 0x1f3   : > { %1201 = vpow2.f32 %v631_v20  ;;  %v626_v22 = vsub.f32 %v570_v45, %v621_v21 }
 0x1f5   : > { %v633_v23 = vmul.f32 1.442695, %v626_v22 }
 0x1f7   : > { %1203 = vpow2.f32 %v633_v23 }
 0x1f8   : > { %v1198_v24 = vpop.eup %1197  ;;  %1205 = vpow2.f32 %v597_v33 }
 0x1f9   : > { %v643_v25 = vsel %vm337_vm0, %v1198_v24, 0.0  ;;  %v692_v26 = vpack.c.bf16 %v1198_v24, %v1198_v24  ;;  %1207 = vpow2.f32 %v595_v35 }
 0x1fa   : > { %644 = vadd.xlane.f32.xlu1 %v643_v25  ;;  %1209 = vpow2.f32 %v599_v39 }
 0x1fb   : > { %1146 = vmatmul.mubr.msk.bf16.vlgmr.msra.gmra.mxu0 %vm337_vm0, %v692_v26  ;;  %1211 = vpow2.f32 %v601_v40  ;;  %v667_v26 = vld [vmem:[#allocation4 + $0x18] sm:$0xff] }
 0x1fc   : > { %v1200_v27 = vpop.eup %1199  ;;  %1156 = vmatpush3.bf16.msra.mxu0 %v793_v9  ;;  %1157 = vmatprep.mubr.msk.bf16.mxu0 %vm1246_vm1, %v1245_v0 }
 0x1fd   : > { %v646_v28 = vsel %vm337_vm0, %v1200_v27, 0.0  ;;  %v693_v29 = vpack.c.bf16 %v1200_v27, %v1200_v27 }
 0x1fe   : > { %647 = vadd.xlane.f32.xlu0 %v646_v28 }
 0x1ff   : > { %1152 = vmatmul.mubr.msk.bf16.vlgmr.msra.gmra.mxu1 %vm337_vm0, %v693_v29 }
 0x200   : > { %v1202_v30 = vpop.eup %1201  ;;  %1162 = vmatpush3.bf16.msra.mxu1 %v839_v11  ;;  %1163 = vmatprep.mubr.msk.bf16.mxu1 %vm1246_vm1, %v1245_v0 }
 0x201   : > { %v649_v31 = vsel %vm337_vm0, %v1202_v30, 0.0  ;;  %v694_v32 = vpack.c.bf16 %v1202_v30, %v1202_v30 }
 0x202   : > { %650 = vadd.xlane.f32.xlu1 %v649_v31 }
 0x203   : > { %1158 = vmatmul.mubr.msk.bf16.vlgmr.msra.gmra.mxu0 %vm337_vm0, %v694_v32 }
 0x204   : > { %v1204_v34 = vpop.eup %1203 }
 0x205   : > { %v652_v36 = vsel %vm337_vm0, %v1204_v34, 0.0  ;;  %v695_v37 = vpack.c.bf16 %v1204_v34, %v1204_v34  ;;  %v1206_v0 = vpop.eup %1205  ;;  %v666_v34 = vld [vmem:[#allocation4 + $0x10] sm:$0xff] }
 0x206   : > { %653 = vadd.xlane.f32.xlu1 %v652_v36  ;;  %v1208_v38 = vpop.eup %1207  ;;  %v640_v46 = vmul.f32 %v1206_v0, %v636_v44 }
 0x207   : > { %1164 = vmatmul.mubr.msk.bf16.vlgmr.msra.gmra.mxu1 %vm337_vm0, %v695_v37  ;;  %v639_v42 = vmul.f32 %v1208_v38, %v635_v41  ;;  %v1210_v47 = vpop.eup %1209 }
 0x208   : > { %v641_v51 = vmul.f32 %v1210_v47, %v637_v49  ;;  %v1212_v52 = vpop.eup %1211 }
 0x209   : > { %v642_v57 = vmul.f32 %v1212_v52, %v638_v54 }
 0x214   : > { %675 = vperm.xlu0 %1195, %v1206_v0  }
 0x217   : > { %670 = vperm.xlu1 %1196, %v1208_v38  }
 0x283   : > { %v645_v43 = vpop.xlane.xlu1 %644 }
 0x284   : > { %v655_v45 = vadd.f32 %v645_v43, %v639_v42 }
 0x286   : > { %660 = vst.msk [vmem:[#allocation3] sm:$0xff] %vm328_vm2, %v655_v45 }
 0x287   : > { %v648_v48 = vpop.xlane.xlu0 %647 }
 0x288   : > { %v656_v50 = vadd.f32 %v648_v48, %v640_v46 }
 0x28a   : > { %661 = vst.msk [vmem:[#allocation3 + $0x8] sm:$0xff] %vm328_vm2, %v656_v50 }
 0x28b   : > { %v651_v53 = vpop.xlane.xlu1 %650 }
 0x28c   : > { %v657_v55 = vadd.f32 %v651_v53, %v641_v51 }
 0x28d   : > { %v900_v56 = vld [vmem:[#allocation3] sm:$0xff] }
 0x28e   : > { %662 = vst.msk [vmem:[#allocation3 + $0x10] sm:$0xff] %vm328_vm2, %v657_v55  ;;  %906 = vperm.xlu1 %1196, %v900_v56  }
 0x28f   : > { %v654_v58 = vpop.xlane.xlu1 %653  ;;  %v676_v4 = vpop.permute.xlu0 %675 }
 0x290   : > { %v658_v59 = vadd.f32 %v654_v58, %v642_v57  ;;  %v689_v8 = vmul.f32 %v676_v4, %v665_v3 }
 0x291   : > { %v901_v60 = vld [vmem:[#allocation3 + $0x8] sm:$0xff] }
 0x292   : > { %663 = vst.msk [vmem:[#allocation3 + $0x18] sm:$0xff] %vm328_vm2, %v658_v59  ;;  %911 = vperm.xlu0 %1195, %v901_v60  }
 0x293   : > { %v671_v1 = vpop.permute.xlu1 %670 }
 0x294   : > { %v688_v2 = vmul.f32 %v671_v1, %v664_v63 }
 0x295   : > { %v902_v61 = vld [vmem:[#allocation3 + $0x10] sm:$0xff] }
 0x296   : > { %685 = vperm.xlu0 %1195, %v1212_v52   ;;  %916 = vperm.xlu1 %1196, %v902_v61  }
 0x299   : > { %v903_v62 = vld [vmem:[#allocation3 + $0x18] sm:$0xff] }
 0x29a   : > { %921 = vperm.xlu1 %1196, %v903_v62  }
 0x29e   : > { %680 = vperm.xlu1 %1196, %v1210_v47  }
 0x2bb   : > { %v737_v5 = vpop.f32.mrf.mxu0 }
 0x2bc   : > { %v881_v6 = vadd.f32 %v737_v5, %v688_v2 }
 0x2bd   : > { %v1147_v7 = vpop.f32.mrf.mxu0 }
 0x2be   : > { %885 = vst.msk [vmem:[#allocation4] sm:$0xff] %vm337_vm0, %v881_v6 }
 0x2bf   : > { %v740_v9 = vpop.f32.mrf.mxu0  ;;  %v783_v10 = vpop.f32.mrf.mxu1 }
 0x2c0   : > { %v882_v11 = vadd.f32 %v783_v10, %v689_v8 }
 0x2c1   : > { %v1148_v12 = vpop.f32.mrf.mxu0  ;;  %v1153_v13 = vpop.f32.mrf.mxu1 }
 0x2c2   : > { %886 = vst.msk [vmem:[#allocation4 + $0x8] sm:$0xff] %vm337_vm0, %v882_v11 }
 0x2c3   : > { %v786_v14 = vpop.f32.mrf.mxu1  ;;  %v829_v15 = vpop.f32.mrf.mxu0 }
 0x2c5   : > { %v1154_v16 = vpop.f32.mrf.mxu1  ;;  %v1159_v17 = vpop.f32.mrf.mxu0  ;;  %v896_v33 = vld [vmem:[#allocation4] sm:$0xff] }
 0x2c7   : > { %v832_v18 = vpop.f32.mrf.mxu0  ;;  %v875_v19 = vpop.f32.mrf.mxu1 }
 0x2c9   : > { %v1160_v20 = vpop.f32.mrf.mxu0  ;;  %v1165_v21 = vpop.f32.mrf.mxu1  ;;  %v897_v39 = vld [vmem:[#allocation4 + $0x8] sm:$0xff] }
 0x2cb   : > { %v878_v22 = vpop.f32.mrf.mxu1 }
 0x2cd   : > { %v1166_v23 = vpop.f32.mrf.mxu1 }
 0x309   : > { %v907_v24 = vpop.permute.xlu1 %906 }
 0x30a   : > { %1213 = vrcp.f32 %v907_v24 }
 0x30d   : > { %v912_v25 = vpop.permute.xlu0 %911 }
 0x30e   : > { %1215 = vrcp.f32 %v912_v25 }
 0x311   : > { %v686_v27 = vpop.permute.xlu0 %685  ;;  %v917_v28 = vpop.permute.xlu1 %916 }
 0x312   : > { %v691_v29 = vmul.f32 %v686_v27, %v667_v26 }
 0x314   : > { %v884_v30 = vadd.f32 %v875_v19, %v691_v29 }
 0x315   : > { %v922_v31 = vpop.permute.xlu1 %921 }
 0x316   : > { %888 = vst.msk [vmem:[#allocation4 + $0x18] sm:$0xff] %vm337_vm0, %v884_v30  ;;  %1217 = vrcp.f32 %v922_v31 }
 0x317   : > { %v1214_v32 = vpop.eup %1213  ;;  %1219 = vrcp.f32 %v917_v28 }
 0x318   : > { %v925_v35 = vmul.f32 %v1214_v32, %v896_v33 }
 0x319   : > { %v681_v36 = vpop.permute.xlu1 %680 }
 0x31a   : > { %v932_v37 = vpack.c.bf16 %v925_v35, %v925_v35  ;;  %v690_v0 = vmul.f32 %v681_v36, %v666_v34 }
 0x31b   : > { %v1216_v38 = vpop.eup %1215 }
 0x31c   : > { %937 = vst.msk [vmem:[%s322_s8] sm:$0xf] %vm936_vm5, %v932_v37  ;;  %v927_v40 = vmul.f32 %v1216_v38, %v897_v39  ;;  %v883_v41 = vadd.f32 %v829_v15, %v690_v0 }
 0x31d   : > { %v899_v44 = vld [vmem:[#allocation4 + $0x18] sm:$0xff] }
 0x31e   : > { %v933_v42 = vpack.c.bf16 %v927_v40, %v927_v40  ;;  %887 = vst.msk [vmem:[#allocation4 + $0x10] sm:$0xff] %vm337_vm0, %v883_v41 }
 0x320   : > { %938 = vst.msk [vmem:[%s322_s8 + $0x4] sm:$0xf] %vm936_vm5, %v933_v42 }
 0x323   : > { %v1218_v43 = vpop.eup %1217 }
 0x324   : > { %v931_v45 = vmul.f32 %v1218_v43, %v899_v44  ;;  %v1220_v46 = vpop.eup %1219 }
 0x325   : > { %v898_v47 = vld [vmem:[#allocation4 + $0x10] sm:$0xff] }
 0x326   : > { %v935_v48 = vpack.c.bf16 %v931_v45, %v931_v45  ;;  %v929_v49 = vmul.f32 %v1220_v46, %v898_v47 }
 0x328   : > { %940 = vst.msk [vmem:[%s322_s8 + $0xc] sm:$0xf] %vm936_vm5, %v935_v48  ;;  %v934_v50 = vpack.c.bf16 %v929_v49, %v929_v49 }
 0x32a   : > { %939 = vst.msk [vmem:[%s322_s8 + $0x8] sm:$0xf] %vm936_vm5, %v934_v50 }
 0x32b PF: > { %s14_s17 = sadd.s32 1, %s1243_s17   ;;  %s1468_s15 = smov %s1239_s16 }
 0x32c   : > { %p11_p5 = scmp.ge.s32.totalorder %s14_s17, 4   ;;  %s1469_s16 = smov %s1471_s18 }
 0x32e   :  { %13 = sbr.rel (!%p11_p5) target bundleno = 2 (0x2), region = 83 }

// kernel: gpt2_forward.8
= control target key start
LH: loop header
LB: loop body
LE: loop exit
PB: predicated region body
PF: predicated region fallthrough
CT: control target
= control target key end

     0   :  { %s1179_s21 = smov 0   ;;  %s1181_s22 = smov 0   ;;  %s1298_s0 = inlined_call_operand.vmem [shape: f32[2,8,32], index: 0, kind: input, shape index: {}]   ;;  %s1299_s1 = inlined_call_operand.vmem [shape: bf16[2,8,32], index: 1, kind: input, shape index: {}]   ;;  %s1300_s2 = inlined_call_operand.vmem [shape: bf16[32,32], index: 2, kind: input, shape index: {}]   ;;  %s1301_s3 = inlined_call_operand.vmem [shape: f32[1,32], index: 3, kind: input, shape index: {}]   ;;  %s1302_s4 = inlined_call_operand.vmem [shape: f32[1,32], index: 4, kind: input, shape index: {}]   ;;  %s1303_s5 = inlined_call_operand.vmem [shape: f32[1,32], index: 5, kind: input, shape index: {}]   ;;  %s1304_s6 = inlined_call_operand.vmem [shape: bf16[32,128], index: 6, kind: input, shape index: {}]   ;;  %s1305_s7 = inlined_call_operand.vmem [shape: f32[1,128], index: 7, kind: input, shape index: {}]   ;;  %s1306_s8 = inlined_call_operand.vmem [shape: bf16[128,32], index: 8, kind: input, shape index: {}]   ;;  %s1307_s9 = inlined_call_operand.vmem [shape: f32[1,32], index: 9, kind: input, shape index: {}]   ;;  %s1308_s10 = inlined_call_operand.vmem [shape: f32[1,32], index: 10, kind: input, shape index: {}]   ;;  %s1309_s11 = inlined_call_operand.vmem [shape: f32[1,32], index: 11, kind: input, shape index: {}]   ;;  %s1310_s12 = inlined_call_operand.vmem [shape: f32[2,8,32], index: 12, kind: output, shape index: {}]  }
   0x1   :  { %s1183_s23 = smov 0  }
   0x2 LB: > { %s41_s10 = sadd.s32 1, %s1106_s22  ;;  %p972_p0 = scmp.ge.s32.totalorder %s1110_s23, 1  ;;  %s1110_s23 = sphi %s1183_s23, %s22_s23   ;;  %s1106_s22 = sphi %s1181_s22, %s1312_s22   ;;  %s1102_s21 = sphi %s1179_s21, %s1311_s21  }
   0x3   : > { %p43_p1 = scmp.ge.s32.totalorder %s41_s10, 2  ;;  %p429_p2 = scmp.lt.s32.totalorder %s1110_s23, 3 }
   0x5   : > { %s1314_s10 = smov (%p43_p1, %s41_s10), 0  ;;  %p430_p3 = pnand %p972_p0, %p429_p2 }
   0x6   : > { %p494_p4 = scmp.lt.s32.totalorder (!%p430_p3), %s1102_s21, 1 }
   0x7   : > { %433 = sbr.rel (%p430_p3) target bundleno = 943 (0x3af), region = 68 }
   0xc   : > { %v1074_v0 = vld [vmem:[%s1300_s2 + $0x8] sm:$0xff]   ;;  %v1112_v1 = vmov 0.0   ;;  %v1075_v2 = vld [vmem:[%s1300_s2] sm:$0xff]   ;;  %vm1113_vm0 = vmmov 0   ;;  %vm557_vm1 = vcmask 261120   ;;  %s1316_s21 = smov (!%p494_p4, %s1102_s21), 1 }
   0xd   : > { %1012 = vmatprep.subr.bf16.mxu1 %v1112_v1  ;;  %1028 = vmatprep.subr.bf16.mxu0 %v1112_v1  ;;  %637 = vst.msk [vmem:[#allocation4] sm:$0xff] %vm557_vm1, %v1112_v1  ;;  %s974_s27 = sshll.u32 %s1316_s21, 2  ;;  %s973_s13 = sshll.u32 %s1316_s21, 3  ;;  %v976_v4 = vld [vmem:[%s1301_s3] ss:$0 sm:$0xff]  ;;  %v1076_v18 = vld [vmem:[%s1304_s6 + $0x8] sm:$0xff]  }
   0xe   : > { %1013 = vmatpush3.bf16.msra.mxu1 %v1074_v0  ;;  %1016 = vmatprep.mubr.msk.bf16.mxu1 %vm1113_vm0, %v1112_v1  ;;  %s507_s30 = scalar_lea.vmem %s1299_s1, %s974_s27  ;;  %s500_s16 = scalar_lea.vmem %s1298_s0, %s973_s13  ;;  %v1077_v19 = vld [vmem:[%s1304_s6] sm:$0xff]   ;;  %v1078_v20 = vld [vmem:[%s1306_s8 + $0x38] sm:$0xff]   ;;  %v1079_v21 = vld [vmem:[%s1306_s8 + $0x30] sm:$0xff]   ;;  %vm635_vm2 = vcmask 257024  }
   0xf   : > { %1014 = vmatprep.subr.bf16.mxu1 %v1112_v1  ;;  %1044 = vmatprep.mubr.msk.bf16.mxu0 %vm1113_vm0, %v1112_v1  ;;  %v533_v3 = vld [vmem:[%s507_s30] sm:$0xf]  ;;  %v1080_v22 = vld [vmem:[%s1306_s8 + $0x28] sm:$0xff]   ;;  %v1082_v24 = vld [vmem:[%s1306_s8 + $0x18] sm:$0xff]   ;;  %s527_s19 = scalar_lea.vmem %s1310_s12, %s973_s13 }
  0x10   : > { %v601_v6 = vld [vmem:[%s500_s16] sm:$0xff]  ;;  %1029 = vmatpush3.bf16.msra.mxu0 %v1078_v20  ;;  %v1083_v25 = vld [vmem:[%s1306_s8 + $0x10] sm:$0xff]   ;;  %v1084_v37 = vld [vmem:[%s1306_s8 + $0x8] sm:$0xff]  }
  0x11   : > { %1030 = vmatprep.subr.bf16.mxu0 %v1112_v1  ;;  %v1081_v23 = vld [vmem:[%s1306_s8 + $0x20] sm:$0xff]  }
  0x12   : > { %1015 = vmatpush3.bf16.msra.mxu1 %v1075_v2  ;;  %v980_v30 = vld [vmem:[%s1302_s4] ss:$0 sm:$0xff] }
  0x13   : > { %1020 = vmatprep.subr.bf16.mxu1 %v1112_v1  ;;  %v981_v32 = vld [vmem:[%s1303_s5] ss:$0 sm:$0xff] }
  0x14   : > { %1031 = vmatpush3.bf16.msra.mxu0 %v1079_v21  ;;  %v1085_v38 = vld [vmem:[%s1306_s8] sm:$0xff]   ;;  %v707_v47 = vld [vmem:[#allocation4] sm:$0xff] }
  0x15   : > { %1017 = vmatmul.mubr.msk.bf16.vlgmr.msra.gmra.mxu1 %vm557_vm1, %v533_v3  ;;  %1032 = vmatprep.subr.bf16.mxu0 %v1112_v1  ;;  %v982_v39 = vld [vmem:[%s1305_s7] ss:$0 sm:$0xff] }
  0x16   : > { %1024 = vmatprep.mubr.msk.bf16.mxu1 %vm1113_vm0, %v1112_v1  ;;  %1021 = vmatpush3.bf16.msra.mxu1 %v1076_v18  ;;  %v994_v55 = vld [vmem:[%s1307_s9] ss:$0 sm:$0xff] }
  0x17   : > { %1022 = vmatprep.subr.bf16.mxu1 %v1112_v1 }
  0x18   : > { %1033 = vmatpush3.bf16.msra.mxu0 %v1080_v22 }
  0x19   : > { %1034 = vmatprep.subr.bf16.mxu0 %v1112_v1 }
  0x1a   : > { %1023 = vmatpush3.bf16.msra.mxu1 %v1077_v19 }
  0x1c   : > { %1035 = vmatpush3.bf16.msra.mxu0 %v1081_v23 }
  0x1d   : > { %1036 = vmatprep.subr.bf16.mxu0 %v1112_v1 }
  0x20   : > { %1037 = vmatpush3.bf16.msra.mxu0 %v1082_v24 }
  0x21   : > { %1038 = vmatprep.subr.bf16.mxu0 %v1112_v1 }
  0x24   : > { %1039 = vmatpush3.bf16.msra.mxu0 %v1083_v25 }
  0x25   : > { %1040 = vmatprep.subr.bf16.mxu0 %v1112_v1 }
  0x28   : > { %1041 = vmatpush3.bf16.msra.mxu0 %v1084_v37 }
  0x29   : > { %1042 = vmatprep.subr.bf16.mxu0 %v1112_v1 }
  0x2c   : > { %1043 = vmatpush3.bf16.msra.mxu0 %v1085_v38 }
  0xd5   : > { %v595_v5 = vpop.f32.mrf.mxu1 }
  0xd6   : > { %v596_v7 = vadd.f32 %v976_v4, %v595_v5 }
  0xd7   : > { %v1018_v8 = vpop.f32.mrf.mxu1 }
  0xd8   : > { %v602_v9 = vadd.f32 %v601_v6, %v596_v7 }
  0xd9   : > { %v598_v10 = vpop.f32.mrf.mxu1 }
  0xda   : > { %603 = vst.msk [vmem:[#allocation2] sm:$0xff] %vm557_vm1, %v602_v9  ;;  %v606_v11 = vsel %vm557_vm1, %v602_v9, 0.0 }
  0xdb   : > { %v1019_v12 = vpop.f32.mrf.mxu1  ;;  %607 = vadd.xlane.f32.xlu0 %v606_v11 }
  0xe1   : > { %v818_v53 = vld [vmem:[#allocation2] sm:$0xff] }
 0x164   : > { %v608_v13 = vpop.xlane.xlu0 %607 }
 0x165   : > { %v610_v14 = vmul.f32 0.03125, %v608_v13 }
 0x167   : > { %v611_v15 = vsub.f32 %v602_v9, %v610_v14 }
 0x169   : > { %v612_v16 = vmul.f32 %v611_v15, %v611_v15 }
 0x16b   : > { %v613_v17 = vsel %vm557_vm1, %v612_v16, 0.0 }
 0x16c   : > { %614 = vadd.xlane.f32.xlu0 %v613_v17 }
 0x1f5   : > { %v615_v26 = vpop.xlane.xlu0 %614 }
 0x1f6   : > { %v616_v27 = vmul.f32 0.03125, %v615_v26 }
 0x1f8   : > { %v617_v28 = vadd.f32 1e-05, %v616_v27 }
 0x1fa   : > { %1086 = vrsqrt.f32 %v617_v28 }
 0x207   : > { %v1087_v29 = vpop.eup %1086 }
 0x208   : > { %v619_v31 = vmul.f32 %v1087_v29, %v611_v15 }
 0x20a   : > { %v626_v33 = vmul.f32 %v980_v30, %v619_v31 }
 0x20c   : > { %v633_v34 = vadd.f32 %v981_v32, %v626_v33 }
 0x20e   : > { %v634_v35 = vpack.c.bf16 %v633_v34, %v633_v34 }
 0x210   : > { %636 = vst.msk [vmem:[#allocation3] sm:$0xf] %vm635_vm2, %v634_v35 }
 0x217   : > { %v638_v36 = vld [vmem:[#allocation3] sm:$0xf] }
 0x218   : > { %1025 = vmatmul.mubr.msk.bf16.vlgmr.msra.gmra.mxu1 %vm557_vm1, %v638_v36 }
 0x2d8   : > { %v700_v40 = vpop.f32.mrf.mxu1 }
 0x2d9   : > { %v701_v41 = vadd.f32 %v982_v39, %v700_v40 }
 0x2da   : > { %v1026_v42 = vpop.f32.mrf.mxu1 }
 0x2db   : > { %v706_v43 = vmax.f32 %v701_v41, 0.0 }
 0x2dc   : > { %v703_v44 = vpop.f32.mrf.mxu1 }
 0x2dd   : > { %v708_v45 = vpack.c.bf16 %v706_v43, %v706_v43 }
 0x2de   : > { %v1027_v46 = vpop.f32.mrf.mxu1 }
 0x2df   : > { %1045 = vmatmul.mubr.bf16.vlgmr.msra.gmra.mxu0 %v708_v45 }
 0x39f   : > { %v807_v48 = vpop.f32.mrf.mxu0 }
 0x3a0   : > { %v813_v49 = vadd.f32 %v807_v48, %v707_v47 }
 0x3a1   : > { %v1046_v50 = vpop.f32.mrf.mxu0 }
 0x3a2   : > { %814 = vst.msk [vmem:[#allocation4] sm:$0xff] %vm557_vm1, %v813_v49 }
 0x3a3   : > { %v810_v51 = vpop.f32.mrf.mxu0 }
 0x3a5   : > { %v1047_v52 = vpop.f32.mrf.mxu0 }
 0x3a9   : > { %v819_v54 = vld [vmem:[#allocation4] sm:$0xff] }
 0x3aa   : > { %v820_v56 = vadd.f32 %v819_v54, %v818_v53 }
 0x3ac   : > { %v828_v57 = vadd.f32 %v994_v55, %v820_v56 }
 0x3ae   : > { %829 = vst.msk [vmem:[%s527_s19] sm:$0xff] %vm557_vm1, %v828_v57 }
 0x3af PF: > { %s22_s23 = sadd.s32 1, %s1110_s23   ;;  %s1311_s21 = smov %s1106_s22 }
 0x3b0   : > { %p19_p5 = scmp.ge.s32.totalorder %s22_s23, 4   ;;  %s1312_s22 = smov %s1314_s10 }
 0x3b2   :  { %21 = sbr.rel (!%p19_p5) target bundleno = 2 (0x2), region = 118 }

// kernel: gpt2_forward.11
= control target key start
LH: loop header
LB: loop body
LE: loop exit
PB: predicated region body
PF: predicated region fallthrough
CT: control target
= control target key end

     0   :  { %s1491_s0 = inlined_call_operand.vmem [shape: f32[2,8,32], index: 0, kind: input, shape index: {}]   ;;  %s1492_s1 = inlined_call_operand.vmem [shape: bf16[2,8,32], index: 1, kind: input, shape index: {}]   ;;  %s1493_s2 = inlined_call_operand.vmem [shape: bf16[32,32], index: 2, kind: input, shape index: {}]   ;;  %s1494_s3 = inlined_call_operand.vmem [shape: f32[1,32], index: 3, kind: input, shape index: {}]   ;;  %s1495_s4 = inlined_call_operand.vmem [shape: f32[1,32], index: 4, kind: input, shape index: {}]   ;;  %s1496_s5 = inlined_call_operand.vmem [shape: f32[1,32], index: 5, kind: input, shape index: {}]   ;;  %s1497_s6 = inlined_call_operand.vmem [shape: bf16[32,128], index: 6, kind: input, shape index: {}]   ;;  %s1498_s7 = inlined_call_operand.vmem [shape: f32[1,128], index: 7, kind: input, shape index: {}]   ;;  %s1499_s8 = inlined_call_operand.vmem [shape: bf16[128,32], index: 8, kind: input, shape index: {}]   ;;  %s1500_s9 = inlined_call_operand.vmem [shape: f32[1,32], index: 9, kind: input, shape index: {}]   ;;  %s1501_s10 = inlined_call_operand.vmem [shape: f32[1,32], index: 10, kind: input, shape index: {}]   ;;  %s1502_s11 = inlined_call_operand.vmem [shape: f32[1,32], index: 11, kind: input, shape index: {}]   ;;  %s1503_s12 = inlined_call_operand.hbm [shape: f32[2,8,32], index: 12, kind: output, shape index: {}]  }
   0x1   :  { %1506 = sst [smem:[#allocation10_spill]] %s1491_s0 }
   0x2   :  { %1507 = sst [smem:[#allocation11_spill]] %s1492_s1 }
   0x3   :  { %1508 = sst [smem:[#allocation12_spill]] %s1493_s2 }
   0x4   :  { %17 = vsyncpa [#allocation6], 0 }
   0x5   :  { %19 = vsyncpa [#allocation6 + $0x1], 0  ;;  %s1306_s21 = smov 0   ;;  %s1308_s22 = smov 0  }
   0x6   :  { %s1310_s23 = smov 0   ;;  %s1312_s24 = smov 0  }
   0x7   :  { %s1314_s25 = smov 0   ;;  %s1316_s26 = smov 0  }
   0x8 LB: > { %1509 = sst [smem:[#allocation8_spill]] %s1232_s25  ;;  %s1000_s27 = sadd.s32 4294967295, %s1236_s26   ;;  %s1236_s26 = sphi %s1316_s26, %s25_s26   ;;  %s1232_s25 = sphi %s1314_s25, %s1517_s25   ;;  %s1228_s24 = sphi %s1312_s24, %s1516_s24   ;;  %s1224_s23 = sphi %s1310_s23, %s1520_s23   ;;  %s1220_s22 = sphi %s1308_s22, %s1519_s22   ;;  %s1216_s21 = sphi %s1306_s21, %s1518_s21  }
   0x9   : > { %s1001_s28 = sadd.s32 4294967294, %s1236_s26   ;;  %s44_s29 = sadd.s32 1, %s1232_s25 }
   0xa   : > { %s334_s30 = sadd.s32 1, %s1224_s23  ;;  %p46_p0 = scmp.ge.s32.totalorder %s44_s29, 2 }
   0xb   : > { %p344_p1 = scmp.ne.s32.totalorder %s1224_s23, %s1220_s22  ;;  %p345_p2 = scmp.eq.s32.totalorder %s1000_s27, 1 }
   0xc   : > { %p350_p3 = scmp.ne.s32.totalorder %s1220_s22, %s1216_s21  ;;  %s1522_s29 = smov (%p46_p0, %s44_s29), 0 }
   0xd   : > { %1510 = sst [smem:[#allocation9_spill]] %s1522_s29  ;;  %p1346_p4 = por %p345_p2, %p344_p1 }
   0xe   : > { %p351_p5 = scmp.eq.s32.totalorder %s1001_s28, 1  ;;  %s329_s14 = ssub.s32 %s1232_s25, %s1522_s29 }
   0xf   : > { %p1007_p6 = scmp.ge.s32.totalorder %s1236_s26, 1  ;;  %p332_p7 = scmp.eq.s32.totalorder %s329_s14, 0 }
  0x10   : > { %p1353_p8 = por %p351_p5, %p350_p3  ;;  %p432_p9 = scmp.lt.s32.totalorder %s1236_s26, 3 }
  0x11   : > { %s1359_s16 = scalar_select %p332_p7, %s1224_s23, %s334_s30  }
  0x12   : > { %p433_p10 = pnand %p1007_p6, %p432_p9 }
  0x13   : > { %s1513_s2 = sld [smem:[#allocation12_spill]] (!%p433_p10)  ;;  %p495_p11 = scmp.lt.s32.totalorder (!%p433_p10), %s1228_s24, 1 }
  0x14   : > { %436 = sbr.rel (%p433_p10) target bundleno = 1276 (0x4fc), region = 68  ;;  %s1514_s1 = sld [smem:[#allocation11_spill]] (!%p433_p10) }
  0x15   : > { %s1515_s0 = sld [smem:[#allocation10_spill]] (!%p433_p10)  ;;  %s492_s14 = sand.u32 (!%p433_p10), 1, %s1220_s22  }
  0x16   : > { %s1033_s29 = sshll.u32 (!%p433_p10), %s1228_s24, 7  ;;  %s1240_s19 = smov (!%p433_p10), [#allocation5]  }
  0x17   : > { %s1164_s20 = sshll.u32 (!%p433_p10), %s1240_s19, 4  ;;  %s1165_s20 = int_to_ptr.vmem [resolvable:$false] %s1164_s20 }
  0x19   : > { %v1144_v0 = vld [vmem:[%s1513_s2 + $0x8] sm:$0xff]   ;;  %v1238_v1 = vmov 0.0   ;;  %v1145_v2 = vld [vmem:[%s1513_s2] sm:$0xff]   ;;  %vm1239_vm0 = vmmov 0   ;;  %vm551_vm1 = vcmask 261120   ;;  %s496_s27 = scalar_select %p495_p11, %s1228_s24, 1 }
  0x1a   : > { %1051 = vmatprep.subr.bf16.mxu1 %v1238_v1  ;;  %1067 = vmatprep.subr.bf16.mxu0 %v1238_v1  ;;  %631 = vst.msk [vmem:[#allocation4] sm:$0xff] %vm551_vm1, %v1238_v1  ;;  %v1011_v4 = vld [vmem:[%s1494_s3] ss:$0 sm:$0xff]  ;;  %v1146_v18 = vld [vmem:[%s1497_s6 + $0x8] sm:$0xff]   ;;  %v1148_v20 = vld [vmem:[%s1499_s8 + $0x38] sm:$0xff]   ;;  %vm629_vm2 = vcmask 257024  }
  0x1b   : > { %1052 = vmatpush3.bf16.msra.mxu1 %v1144_v0  ;;  %1055 = vmatprep.mubr.msk.bf16.mxu1 %vm1239_vm0, %v1238_v1  ;;  %s1010_s28 = sshll.u32 %s496_s27, 2  ;;  %s1009_s18 = sshll.u32 %s496_s27, 3  ;;  %v1147_v19 = vld [vmem:[%s1497_s6] sm:$0xff]   ;;  %v1149_v21 = vld [vmem:[%s1499_s8 + $0x30] sm:$0xff]   ;;  %v1150_v22 = vld [vmem:[%s1499_s8 + $0x28] sm:$0xff]  }
  0x1c   : > { %1053 = vmatprep.subr.bf16.mxu1 %v1238_v1  ;;  %1083 = vmatprep.mubr.msk.bf16.mxu0 %vm1239_vm0, %v1238_v1  ;;  %s508_s17 = scalar_lea.vmem %s1514_s1, %s1010_s28  ;;  %s501_s2 = scalar_lea.vmem %s1515_s0, %s1009_s18  ;;  %v1151_v23 = vld [vmem:[%s1499_s8 + $0x20] sm:$0xff]   ;;  %v1152_v24 = vld [vmem:[%s1499_s8 + $0x18] sm:$0xff]   ;;  %v1153_v25 = vld [vmem:[%s1499_s8 + $0x10] sm:$0xff]  }
  0x1d   : > { %v527_v3 = vld [vmem:[%s508_s17] sm:$0xf]  ;;  %1068 = vmatpush3.bf16.msra.mxu0 %v1148_v20  ;;  %v1154_v37 = vld [vmem:[%s1499_s8 + $0x8] sm:$0xff]   ;;  %s1008_s17 = sshll.u32 %s492_s14, 3  ;;  %s867_s0 = scalar_lea.hbm %s1503_s12, %s1033_s29 }
  0x1e   : > { %v595_v6 = vld [vmem:[%s501_s2] sm:$0xff]  ;;  %1069 = vmatprep.subr.bf16.mxu0 %v1238_v1  ;;  %s494_s2 = scalar_lea.vmem [#allocation5], %s1008_s17  ;;  %s855_s1 = scalar_lea.sflag [#allocation6], %s492_s14 }
  0x1f   : > { %1054 = vmatpush3.bf16.msra.mxu1 %v1145_v2  ;;  %v1015_v30 = vld [vmem:[%s1495_s4] ss:$0 sm:$0xff]  ;;  %s869_s27 = sshll.u32 %s494_s2, 4  ;;  %s1166_s24 = scalar_lea.vmem %s1165_s20, 256  ;;  %s870_s27 = int_to_ptr.vmem [resolvable:$true] %s869_s27 }
  0x20   : > { %1059 = vmatprep.subr.bf16.mxu1 %v1238_v1  ;;  %v1016_v32 = vld [vmem:[%s1496_s5] ss:$0 sm:$0xff]  ;;  %s1160_s18 = scalar_lea.vmem %s870_s27, 128  ;;  %p1167_p1 = scmp.lt.s32.totalorder %s870_s27, %s1165_s20 }
  0x21   : > { %1070 = vmatpush3.bf16.msra.mxu0 %v1149_v21  ;;  %v1155_v38 = vld [vmem:[%s1499_s8] sm:$0xff]   ;;  %v701_v47 = vld [vmem:[#allocation4] sm:$0xff]  ;;  %p1161_p12 = scmp.ne.s32.totalorder %s870_s27, %s1160_s18  ;;  %p1168_p2 = scmp.lt.s32.totalorder %s1166_s24, %s1160_s18 }
  0x22   : > { %1056 = vmatmul.mubr.msk.bf16.vlgmr.msra.gmra.mxu1 %vm551_vm1, %v527_v3  ;;  %1071 = vmatprep.subr.bf16.mxu0 %v1238_v1  ;;  %v1017_v39 = vld [vmem:[%s1498_s7] ss:$0 sm:$0xff] }
  0x23   : > { %1063 = vmatprep.mubr.msk.bf16.mxu1 %vm1239_vm0, %v1238_v1  ;;  %1060 = vmatpush3.bf16.msra.mxu1 %v1146_v18  ;;  %v1029_v55 = vld [vmem:[%s1500_s9] ss:$0 sm:$0xff]  ;;  %p1162_p13 = pnand %p1161_p12, %p1346_p4  ;;  %p1169_p3 = por %p1168_p2, %p1167_p1 }
  0x24   : > { %1061 = vmatprep.subr.bf16.mxu1 %v1238_v1 }
  0x25   : > { %1072 = vmatpush3.bf16.msra.mxu0 %v1150_v22  ;;  %p1163_p0 = pneg %p1162_p13 }
  0x26   : > { %1073 = vmatprep.subr.bf16.mxu0 %v1238_v1 }
  0x27   : > { %1062 = vmatpush3.bf16.msra.mxu1 %v1147_v19  ;;  %p1170_p5 = pnand %p1169_p3, %p1163_p0 }
  0x29   : > { %1074 = vmatpush3.bf16.msra.mxu0 %v1151_v23 }
  0x2a   : > { %1075 = vmatprep.subr.bf16.mxu0 %v1238_v1 }
  0x2d   : > { %1076 = vmatpush3.bf16.msra.mxu0 %v1152_v24 }
  0x2e   : > { %1077 = vmatprep.subr.bf16.mxu0 %v1238_v1 }
  0x31   : > { %1078 = vmatpush3.bf16.msra.mxu0 %v1153_v25 }
  0x32   : > { %1079 = vmatprep.subr.bf16.mxu0 %v1238_v1 }
  0x35   : > { %1080 = vmatpush3.bf16.msra.mxu0 %v1154_v37 }
  0x36   : > { %1081 = vmatprep.subr.bf16.mxu0 %v1238_v1 }
  0x39   : > { %1082 = vmatpush3.bf16.msra.mxu0 %v1155_v38 }
  0xe2   : > { %v589_v5 = vpop.f32.mrf.mxu1 }
  0xe3   : > { %v590_v7 = vadd.f32 %v1011_v4, %v589_v5  ;;  %v1030_v4 = vld [vmem:[%s1501_s10] ss:$0 sm:$0xff] }
  0xe4   : > { %v1057_v8 = vpop.f32.mrf.mxu1 }
  0xe5   : > { %v596_v9 = vadd.f32 %v595_v6, %v590_v7  ;;  %v1031_v6 = vld [vmem:[%s1502_s11] ss:$0 sm:$0xff] }
  0xe6   : > { %v592_v10 = vpop.f32.mrf.mxu1 }
  0xe7   : > { %597 = vst.msk [vmem:[#allocation2] sm:$0xff] %vm551_vm1, %v596_v9  ;;  %v600_v11 = vsel %vm551_vm1, %v596_v9, 0.0 }
  0xe8   : > { %v1058_v12 = vpop.f32.mrf.mxu1  ;;  %601 = vadd.xlane.f32.xlu0 %v600_v11 }
  0xee   : > { %v812_v53 = vld [vmem:[#allocation2] sm:$0xff] }
 0x171   : > { %v602_v13 = vpop.xlane.xlu0 %601 }
 0x172   : > { %v604_v14 = vmul.f32 0.03125, %v602_v13 }
 0x174   : > { %v605_v15 = vsub.f32 %v596_v9, %v604_v14 }
 0x176   : > { %v606_v16 = vmul.f32 %v605_v15, %v605_v15 }
 0x178   : > { %v607_v17 = vsel %vm551_vm1, %v606_v16, 0.0 }
 0x179   : > { %608 = vadd.xlane.f32.xlu0 %v607_v17 }
 0x202   : > { %v609_v26 = vpop.xlane.xlu0 %608 }
 0x203   : > { %v610_v27 = vmul.f32 0.03125, %v609_v26 }
 0x205   : > { %v611_v28 = vadd.f32 1e-05, %v610_v27 }
 0x207   : > { %1156 = vrsqrt.f32 %v611_v28 }
 0x214   : > { %v1157_v29 = vpop.eup %1156 }
 0x215   : > { %v613_v31 = vmul.f32 %v1157_v29, %v605_v15 }
 0x217   : > { %v620_v33 = vmul.f32 %v1015_v30, %v613_v31 }
 0x219   : > { %v627_v34 = vadd.f32 %v1016_v32, %v620_v33 }
 0x21b   : > { %v628_v35 = vpack.c.bf16 %v627_v34, %v627_v34 }
 0x21d   : > { %630 = vst.msk [vmem:[#allocation3] sm:$0xf] %vm629_vm2, %v628_v35 }
 0x224   : > { %v632_v36 = vld [vmem:[#allocation3] sm:$0xf] }
 0x225   : > { %1064 = vmatmul.mubr.msk.bf16.vlgmr.msra.gmra.mxu1 %vm551_vm1, %v632_v36 }
 0x2e5   : > { %v694_v40 = vpop.f32.mrf.mxu1 }
 0x2e6   : > { %v695_v41 = vadd.f32 %v1017_v39, %v694_v40 }
 0x2e7   : > { %v1065_v42 = vpop.f32.mrf.mxu1 }
 0x2e8   : > { %v700_v43 = vmax.f32 %v695_v41, 0.0 }
 0x2e9   : > { %v697_v44 = vpop.f32.mrf.mxu1 }
 0x2ea   : > { %v702_v45 = vpack.c.bf16 %v700_v43, %v700_v43 }
 0x2eb   : > { %v1066_v46 = vpop.f32.mrf.mxu1 }
 0x2ec   : > { %1084 = vmatmul.mubr.bf16.vlgmr.msra.gmra.mxu0 %v702_v45 }
 0x3ac   : > { %v801_v48 = vpop.f32.mrf.mxu0 }
 0x3ad   : > { %v807_v49 = vadd.f32 %v801_v48, %v701_v47 }
 0x3ae   : > { %v1085_v50 = vpop.f32.mrf.mxu0 }
 0x3af   : > { %808 = vst.msk [vmem:[#allocation4] sm:$0xff] %vm551_vm1, %v807_v49 }
 0x3b0   : > { %v804_v51 = vpop.f32.mrf.mxu0 }
 0x3b2   : > { %v1086_v52 = vpop.f32.mrf.mxu0 }
 0x3b6   : > { %v813_v54 = vld [vmem:[#allocation4] sm:$0xff] }
 0x3b7   : > { %v814_v56 = vadd.f32 %v813_v54, %v812_v53 }
 0x3b9   : > { %v822_v57 = vadd.f32 %v1029_v55, %v814_v56 }
 0x3bb   : > { %v825_v58 = vsel %vm551_vm1, %v822_v57, 0.0 }
 0x3bc   : > { %826 = vadd.xlane.f32.xlu1 %v825_v58 }
 0x445   : > { %v827_v59 = vpop.xlane.xlu1 %826 }
 0x446   : > { %v829_v60 = vmul.f32 0.03125, %v827_v59 }
 0x448   : > { %v830_v61 = vsub.f32 %v822_v57, %v829_v60 }
 0x44a   : > { %v831_v62 = vmul.f32 %v830_v61, %v830_v61 }
 0x44c   : > { %v832_v63 = vsel %vm551_vm1, %v831_v62, 0.0 }
 0x44d   : > { %833 = vadd.xlane.f32.xlu1 %v832_v63 }
 0x4d6   : > { %v834_v0 = vpop.xlane.xlu1 %833 }
 0x4d7   : > { %v835_v1 = vmul.f32 0.03125, %v834_v0 }
 0x4d9   : > { %v836_v2 = vadd.f32 1e-05, %v835_v1 }
 0x4db   : > { %1158 = vrsqrt.f32 %v836_v2 }
 0x4e8   : > { %v1159_v3 = vpop.eup %1158 }
 0x4e9   : > { %v838_v5 = vmul.f32 %v1159_v3, %v830_v61 }
 0x4eb   : > { %v845_v7 = vmul.f32 %v1030_v4, %v838_v5 }
 0x4ed   : > { %v852_v8 = vadd.f32 %v1031_v6, %v845_v7 }
 0x4ef   : > { %853 = vst.msk [vmem:[%s494_s2] sm:$0xff] %vm551_vm1, %v852_v8 }
 0x4f0   : > { %1173 = shalt.err (!%p1170_p5)
}
 0x4f1   : > { %s1174_s17 = scalar_lea.hbm %s867_s0, 128  ;;  %s1178_s29 = scalar_lea.hbm %s1503_s12, 256 }
 0x4f2   : > { %p1175_p6 = scmp.ne.s32.totalorder %s867_s0, %s1174_s17  ;;  %p1179_p10 = scmp.lt.s32.totalorder %s867_s0, %s1503_s12 }
 0x4f3   : > { %p1180_p11 = scmp.lt.s32.totalorder %s1178_s29, %s1174_s17 }
 0x4f4   : > { %p1176_p7 = pnand %p1175_p6, %p1346_p4 }
 0x4f5   : > { %p1181_p12 = por %p1180_p11, %p1179_p10 }
 0x4f6   : > { %p1177_p9 = pneg %p1176_p7 }
 0x4f8   : > { %p1182_p13 = pnand %p1181_p12, %p1177_p9 }
 0x4fa   : > { %1185 = shalt.err (!%p1182_p13)
}
 0x4fb   : > { %1087 = dma.vmem_to_hbm [thread:$0]  (%p1346_p4), %s870_s27, 128, %s867_s0, %s855_s1  }
 0x4fc PF: > { %p1093_p0 = scmp.ge.s32.totalorder %s1236_s26, 2  ;;  %s881_s30 = sand.u32 1, %s1216_s21  }
 0x4fd   : > { %s882_s18 = scalar_lea.sflag [#allocation6], %s881_s30 }
 0x4fe   : > { %p1090_p1 = pnand %p1093_p0, %p1353_p8 }
 0x500   : > { %p1091_p2 = pneg %p1090_p1 }
 0x502   : > { %1211 = dma.done.wait (%p1091_p2), %s882_s18, 128  }
 0x503   : > { %1213 = vsyncadd (%p1091_p2), %s882_s18, 4294967168  ;;  %s25_s26 = sadd.s32 1, %s1236_s26   ;;  %s1516_s24 = sld [smem:[#allocation8_spill]] }
 0x504   : > { %p22_p3 = scmp.ge.s32.totalorder %s25_s26, 4   ;;  %s1517_s25 = sld [smem:[#allocation9_spill]] }
 0x505   : > { %s1518_s21 = smov %s1220_s22  ;;  %s1519_s22 = smov %s1224_s23 }
 0x506   : > { %s1520_s23 = smov %s1359_s16  ;;  %24 = sbr.rel (!%p22_p3) target bundleno = 8 (0x8), region = 123 }
 0x50b   :  { %887 = vsyncpa [#allocation6], 1 }
 0x50c   :  { %889 = vsyncpa [#allocation6 + $0x1], 1 }

</bundles_post_ra>
